<compile_context>
chip_gen: v7x
topology: tpu7x:2x2x1
jax: 0.10.0
libtpu: 0.0.40
codegen_flags: <defaults>
</compile_context>

<pallas_src>
import jax
import jax.numpy as jnp
from jax import lax
from jax.experimental import pallas as pl
from jax.experimental.pallas import tpu as pltpu

EPS = 1e-5


def vae_decoder_kernel(p_ref, w_ref, gb_ref, out_ref):
    # p_ref: (B, dimZ) bf16, w_ref: (dimZ, dimX) bf16, gb_ref: (2, dimX) f32
    B = p_ref.shape[0]
    inv_b = jnp.float32(1.0 / B)

    # Linear on the MXU (bias omitted: exactly cancelled by BN mean subtraction).
    y = jnp.dot(p_ref[...], w_ref[...], preferred_element_type=jnp.float32)

    # BatchNorm1d (training mode) batch statistics in a single pass over y.
    s1 = jnp.sum(y, axis=0, keepdims=True)
    s2 = jnp.sum(y * y, axis=0, keepdims=True)
    mean = s1 * inv_b
    var = s2 * inv_b - mean * mean          # biased variance (PyTorch train mode)

    gamma = gb_ref[0:1, :]
    beta = gb_ref[1:2, :]
    scale = gamma * lax.rsqrt(var + EPS)    # (1, dimX)
    shift = beta - mean * scale             # (1, dimX)
    z = y * scale + shift                   # fused BN: one mul + one add per elem

    # Softmax over the feature (lane) axis, numerically stable.
    z = z - jnp.max(z, axis=1, keepdims=True)
    e = jnp.exp(z)
    d = jnp.sum(e, axis=1, keepdims=True)
    r = pl.reciprocal(d, approx=True)       # EUP vrcp (free slot)
    r = r * (2.0 - d * r)                   # one Newton step -> ~full f32 accuracy
    out_ref[...] = e * r


def vae_decoder_forward(p, w_t, gamma, beta):
    """p: (B, dimZ) f32; w_t: (dimZ, dimX) f32; gamma/beta: (1, dimX) f32."""
    B = p.shape[0]
    dimX = w_t.shape[1]
    # Pack per-feature BN params into one VMEM input (single DMA descriptor).
    gb = jnp.concatenate([gamma, beta], axis=0).astype(jnp.float32)   # (2, dimX)
    # bf16 MXU operands; accumulation stays f32 inside the kernel.
    p_bf = p.astype(jnp.bfloat16)
    w_bf = w_t.astype(jnp.bfloat16)

    vmem = pl.BlockSpec(memory_space=pltpu.MemorySpace.VMEM)
    return pl.pallas_call(
        vae_decoder_kernel,
        out_shape=jax.ShapeDtypeStruct((B, dimX), jnp.float32),
        in_specs=[vmem, vmem, vmem],
        out_specs=vmem,
    )(p_bf, w_bf, gb)


def reference_forward_f32(p, w_t, b, gamma, beta):
    """Exact f32 emulation of the PyTorch forward (bias included)."""
    y = p @ w_t + b
    mean = jnp.mean(y, axis=0, keepdims=True)
    var = jnp.mean((y - mean) ** 2, axis=0, keepdims=True)
    z = (y - mean) / jnp.sqrt(var + EPS) * gamma + beta
    return jax.nn.softmax(z, axis=1)


def reference_forward_bf16(p, w_t, gamma, beta):
    """Same math as the kernel (bf16 matmul, f32 BN/softmax, bias dropped)."""
    y = jnp.dot(p.astype(jnp.bfloat16), w_t.astype(jnp.bfloat16),
                preferred_element_type=jnp.float32)
    mean = jnp.mean(y, axis=0, keepdims=True)
    var = jnp.mean(y * y, axis=0, keepdims=True) - mean * mean
    z = (y - mean) * jax.lax.rsqrt(var + EPS) * gamma + beta
    return jax.nn.softmax(z, axis=1)


if __name__ == "__main__":
    # Batch filled to 256 rows so the MXU row dimension is actually used; dimX
    # kept a multiple of 128 for lane-dense stores.
    B, dimZ, dimX = 256, 64, 256

    key = jax.random.PRNGKey(0)
    k_p, k_w, k_b = jax.random.split(key, 3)

    # PyTorch-Linear-style uniform init; BatchNorm1d init gamma=1, beta=0.
    bound = 1.0 / (dimZ ** 0.5)
    w = jax.random.uniform(k_w, (dimX, dimZ), jnp.float32, -bound, bound)  # torch layout
    w_t = jnp.transpose(w)                                                  # (dimZ, dimX)
    b = jax.random.uniform(k_b, (1, dimX), jnp.float32, -bound, bound)      # cancels under BN
    gamma = jnp.ones((1, dimX), jnp.float32)
    beta = jnp.zeros((1, dimX), jnp.float32)

    p = jax.random.normal(k_p, (B, dimZ), jnp.float32)

    out = vae_decoder_forward(p, w_t, gamma, beta)
    out = jax.block_until_ready(out)

    assert out.shape == (B, dimX)
    # Rows of a softmax must sum to 1.
    assert jnp.allclose(jnp.sum(out, axis=1), 1.0, atol=1e-5)

    # Tight check against a reference using the same bf16-matmul math.
    ref_bf = reference_forward_bf16(p, w_t, gamma, beta)
    assert jnp.allclose(out, ref_bf, atol=1e-5, rtol=1e-4)

    # Looser check against the exact f32 PyTorch-equivalent forward (bias incl.);
    # the only differences are bf16 matmul operands and approx+Newton reciprocal.
    ref_f32 = reference_forward_f32(p, w_t, b, gamma, beta)
    assert jnp.allclose(out, ref_f32, atol=1e-3, rtol=5e-2)

    print("KERNEL_OK")
</pallas_src>

<mosaic_0001>
module attributes {stable_mosaic.version = 11 : i64} {
  func.func @vae_decoder_kernel(%arg0: memref<256x64xbf16, #tpu.memory_space<vmem>>, %arg1: memref<64x256xbf16, #tpu.memory_space<vmem>>, %arg2: memref<2x256xf32, #tpu.memory_space<vmem>>, %arg3: memref<256x256xf32, #tpu.memory_space<vmem>>) attributes {dimension_semantics = [], scalar_prefetch = 0 : i64, scratch_operands = 0 : i64, tpu.core_type = #tpu.core_type<tc>} {
    %c0 = arith.constant 0 : index
    %c0_0 = arith.constant 0 : index
    %0 = vector.load %arg0[%c0, %c0_0] : memref<256x64xbf16, #tpu.memory_space<vmem>>, vector<256x64xbf16>
    %c0_1 = arith.constant 0 : index
    %c0_2 = arith.constant 0 : index
    %1 = vector.load %arg1[%c0_1, %c0_2] : memref<64x256xbf16, #tpu.memory_space<vmem>>, vector<64x256xbf16>
    %cst = arith.constant dense<0.000000e+00> : vector<256x256xf32>
    %2 = tpu.matmul %0, %1, %cst {dimension_numbers = #tpu.dot_dimension_numbers<[1], [0], [0], [1], [0, 0, 1, 1], [], []>} : vector<256x64xbf16>, vector<64x256xbf16>, vector<256x256xf32> -> vector<256x256xf32>
    %cst_3 = arith.constant dense<0.000000e+00> : vector<256xf32>
    %3 = vector.multi_reduction <add>, %2, %cst_3 [0] : vector<256x256xf32> to vector<256xf32>
    %4 = vector.shape_cast %3 : vector<256xf32> to vector<1x256xf32>
    %5 = arith.mulf %2, %2 : vector<256x256xf32>
    %cst_4 = arith.constant dense<0.000000e+00> : vector<256xf32>
    %6 = vector.multi_reduction <add>, %5, %cst_4 [0] : vector<256x256xf32> to vector<256xf32>
    %7 = vector.shape_cast %6 : vector<256xf32> to vector<1x256xf32>
    %cst_5 = arith.constant 3.906250e-03 : f32
    %8 = vector.broadcast %cst_5 : f32 to vector<1x256xf32>
    %9 = arith.mulf %4, %8 : vector<1x256xf32>
    %cst_6 = arith.constant 3.906250e-03 : f32
    %10 = vector.broadcast %cst_6 : f32 to vector<1x256xf32>
    %11 = arith.mulf %7, %10 : vector<1x256xf32>
    %12 = arith.mulf %9, %9 : vector<1x256xf32>
    %13 = arith.subf %11, %12 : vector<1x256xf32>
    %c0_7 = arith.constant 0 : index
    %c0_8 = arith.constant 0 : index
    %14 = vector.load %arg2[%c0_7, %c0_8] : memref<2x256xf32, #tpu.memory_space<vmem>>, vector<1x256xf32>
    %c1 = arith.constant 1 : index
    %c0_9 = arith.constant 0 : index
    %15 = vector.load %arg2[%c1, %c0_9] : memref<2x256xf32, #tpu.memory_space<vmem>>, vector<1x256xf32>
    %cst_10 = arith.constant 9.99999974E-6 : f32
    %16 = vector.broadcast %cst_10 : f32 to vector<1x256xf32>
    %17 = arith.addf %13, %16 : vector<1x256xf32>
    %18 = math.rsqrt %17 : vector<1x256xf32>
    %19 = arith.mulf %14, %18 : vector<1x256xf32>
    %20 = arith.mulf %9, %19 : vector<1x256xf32>
    %21 = arith.subf %15, %20 : vector<1x256xf32>
    %22 = vector.broadcast %19 : vector<1x256xf32> to vector<256x256xf32>
    %23 = arith.mulf %2, %22 : vector<256x256xf32>
    %24 = vector.broadcast %21 : vector<1x256xf32> to vector<256x256xf32>
    %25 = arith.addf %23, %24 : vector<256x256xf32>
    %cst_11 = arith.constant dense<0xFF800000> : vector<256xf32>
    %26 = vector.multi_reduction <maximumf>, %25, %cst_11 [1] : vector<256x256xf32> to vector<256xf32>
    %27 = vector.shape_cast %26 : vector<256xf32> to vector<256x1xf32>
    %28 = vector.broadcast %27 : vector<256x1xf32> to vector<256x256xf32>
    %29 = arith.subf %25, %28 : vector<256x256xf32>
    %30 = math.exp %29 : vector<256x256xf32>
    %cst_12 = arith.constant dense<0.000000e+00> : vector<256xf32>
    %31 = vector.multi_reduction <add>, %30, %cst_12 [1] : vector<256x256xf32> to vector<256xf32>
    %32 = vector.shape_cast %31 : vector<256xf32> to vector<256x1xf32>
    %33 = tpu.reciprocal %32 {approx = true} : vector<256x1xf32> -> vector<256x1xf32>
    %34 = arith.mulf %32, %33 : vector<256x1xf32>
    %cst_13 = arith.constant 2.000000e+00 : f32
    %35 = vector.broadcast %cst_13 : f32 to vector<256x1xf32>
    %36 = arith.subf %35, %34 : vector<256x1xf32>
    %37 = arith.mulf %33, %36 : vector<256x1xf32>
    %38 = vector.broadcast %37 : vector<256x1xf32> to vector<256x256xf32>
    %39 = arith.mulf %30, %38 : vector<256x256xf32>
    %c0_14 = arith.constant 0 : index
    %c0_15 = arith.constant 0 : index
    %40 = vector.load %arg3[%c0_14, %c0_15] : memref<256x256xf32, #tpu.memory_space<vmem>>, vector<256x256xf32>
    tpu.vector_store %arg3[%c0_14, %c0_15], %39 {strides = array<i32>} : memref<256x256xf32, #tpu.memory_space<vmem>>, vector<256x256xf32>,
    return
  }
}

</mosaic_0001>

<bundles_post_ra>
// kernel: tpu_custom_call.1
= control target key start
LH: loop header
LB: loop body
LE: loop exit
PB: predicated region body
PF: predicated region fallthrough
CT: control target
= control target key end

     0   :  { %v1793_v2 = vmov 0   ;;  %vm176_vm0 = vcmask 523264   ;;  %s3198_s0 = inlined_call_operand.vmem [shape: bf16[256,64], index: 0, kind: input, shape index: {}]   ;;  %s3199_s1 = inlined_call_operand.vmem [shape: bf16[64,256], index: 1, kind: input, shape index: {}]   ;;  %s3200_s2 = inlined_call_operand.vmem [shape: f32[2,256], index: 2, kind: input, shape index: {}]   ;;  %s3201_s3 = inlined_call_operand.hbm [shape: f32[256,256], index: 3, kind: output, shape index: {}]  }
   0x1   :  { %v1545_v0 = vld [vmem:[%s3199_s1 + $0x4] ss:$8 sps:$4 sm:$0xff]   ;;  %v1547_v1 = vld [vmem:[%s3199_s1] ss:$8 sps:$4 sm:$0xff]   ;;  %257 = vmatprep.mubr.bf16.mxu0 %v1793_v2  ;;  %337 = vmatprep.mubr.bf16.mxu1 %v1793_v2  ;;  %v1548_v3 = vld [vmem:[%s3199_s1 + $0x14] ss:$8 sps:$4 sm:$0xff]  }
   0x2   :  { %225 = vmatprep.subr.bf16.mxu0 %v1545_v0  ;;  %1532 = vmatprep.subr.bf16.mxu1 %v1545_v0  ;;  %v1550_v4 = vld [vmem:[%s3199_s1 + $0x10] ss:$8 sps:$4 sm:$0xff]   ;;  %v1551_v5 = vld [vmem:[%s3199_s1 + $0x24] ss:$8 sps:$4 sm:$0xff]   ;;  %v1553_v6 = vld [vmem:[%s3199_s1 + $0x20] ss:$8 sps:$4 sm:$0xff]  }
   0x3   :  { %226 = vmatpush1.bf16.msra.mxu0 %v1547_v1  ;;  %1536 = vmatpush1.bf16.msra.mxu1 %v1547_v1  ;;  %v1554_v7 = vld [vmem:[%s3199_s1 + $0x34] ss:$8 sps:$4 sm:$0xff]   ;;  %v1556_v8 = vld [vmem:[%s3199_s1 + $0x30] ss:$8 sps:$4 sm:$0xff]   ;;  %v1557_v9 = vld [vmem:[%s3198_s0] sm:$0xff]  }
   0x4   :  { %227 = vmatprep.subr.bf16.mxu0 %v1548_v3  ;;  %1533 = vmatprep.subr.bf16.mxu1 %v1548_v3  ;;  %v1561_v10 = vld [vmem:[%s3198_s0 + $0x40] sm:$0xff]  }
   0x7   :  { %228 = vmatpush1.bf16.msra.mxu0 %v1550_v4  ;;  %1537 = vmatpush1.bf16.msra.mxu1 %v1550_v4 }
   0x8   :  { %229 = vmatprep.subr.bf16.mxu0 %v1551_v5  ;;  %1534 = vmatprep.subr.bf16.mxu1 %v1551_v5 }
   0xb   :  { %230 = vmatpush1.bf16.msra.mxu0 %v1553_v6  ;;  %1538 = vmatpush1.bf16.msra.mxu1 %v1553_v6 }
   0xc   :  { %231 = vmatprep.subr.bf16.mxu0 %v1554_v7  ;;  %1535 = vmatprep.subr.bf16.mxu1 %v1554_v7 }
   0xf   :  { %232 = vmatpush1.bf16.msra.mxu0 %v1556_v8  ;;  %1539 = vmatpush1.bf16.msra.mxu1 %v1556_v8 }
  0x12   :  { %1515 = vmatmul.mubr.msk.bf16.vlgmr.msra.gmra.mrb[0].mxu0 %vm176_vm0, %v1557_v9  ;;  %1523 = vmatmul.mubr.msk.bf16.vlgmr.msra.gmra.mrb[0].mxu1 %vm176_vm0, %v1561_v10 }
  0x13   :  { %267 = vmatprep.mubr.bf16.mxu0 %v1793_v2  ;;  %347 = vmatprep.mubr.bf16.mxu1 %v1793_v2 }
  0x14   :  { %8 = vsyncpa [#allocation3], 0  ;;  %v1558_v11 = vld [vmem:[%s3198_s0 + $0x8] sm:$0xff]   ;;  %v1559_v13 = vld [vmem:[%s3198_s0 + $0x10] sm:$0xff]  }
  0x15   :  { %v1563_v12 = vld [vmem:[%s3198_s0 + $0x48] sm:$0xff]   ;;  %v1565_v14 = vld [vmem:[%s3198_s0 + $0x50] sm:$0xff]   ;;  %v1560_v15 = vld [vmem:[%s3198_s0 + $0x18] sm:$0xff]  }
  0x16   :  { %v1567_v16 = vld [vmem:[%s3198_s0 + $0x58] sm:$0xff]   ;;  %v1562_v17 = vld [vmem:[%s3198_s0 + $0x20] sm:$0xff]   ;;  %v1564_v19 = vld [vmem:[%s3198_s0 + $0x28] sm:$0xff]  }
  0x17   :  { %v1569_v18 = vld [vmem:[%s3198_s0 + $0x60] sm:$0xff]   ;;  %v1570_v20 = vld [vmem:[%s3198_s0 + $0x68] sm:$0xff]   ;;  %v1566_v21 = vld [vmem:[%s3198_s0 + $0x30] sm:$0xff]  }
  0x18   :  { %v1571_v22 = vld [vmem:[%s3198_s0 + $0x70] sm:$0xff]   ;;  %v1568_v23 = vld [vmem:[%s3198_s0 + $0x38] sm:$0xff]  }
  0x19   :  { %v1572_v24 = vld [vmem:[%s3198_s0 + $0x78] sm:$0xff]  }
  0x1a   :  { %1516 = vmatmul.mubr.msk.bf16.gmra.mrb[4].mxu0 %vm176_vm0, %v1558_v11  ;;  %1524 = vmatmul.mubr.msk.bf16.gmra.mrb[4].mxu1 %vm176_vm0, %v1563_v12 }
  0x1b   :  { %277 = vmatprep.mubr.bf16.mxu0 %v1793_v2  ;;  %357 = vmatprep.mubr.bf16.mxu1 %v1793_v2 }
  0x22   :  { %1517 = vmatmul.mubr.msk.bf16.gmra.mrb[8].mxu0 %vm176_vm0, %v1559_v13  ;;  %1525 = vmatmul.mubr.msk.bf16.gmra.mrb[8].mxu1 %vm176_vm0, %v1565_v14 }
  0x23   :  { %287 = vmatprep.mubr.bf16.mxu0 %v1793_v2  ;;  %367 = vmatprep.mubr.bf16.mxu1 %v1793_v2 }
  0x2a   :  { %1518 = vmatmul.mubr.msk.bf16.gmra.mrb[12].mxu0 %vm176_vm0, %v1560_v15  ;;  %1526 = vmatmul.mubr.msk.bf16.gmra.mrb[12].mxu1 %vm176_vm0, %v1567_v16 }
  0x2b   :  { %297 = vmatprep.mubr.bf16.mxu0 %v1793_v2  ;;  %377 = vmatprep.mubr.bf16.mxu1 %v1793_v2 }
  0x32   :  { %1519 = vmatmul.mubr.msk.bf16.gmra.mrb[16].mxu0 %vm176_vm0, %v1562_v17  ;;  %1527 = vmatmul.mubr.msk.bf16.gmra.mrb[16].mxu1 %vm176_vm0, %v1569_v18 }
  0x33   :  { %307 = vmatprep.mubr.bf16.mxu0 %v1793_v2  ;;  %387 = vmatprep.mubr.bf16.mxu1 %v1793_v2 }
  0x3a   :  { %1520 = vmatmul.mubr.msk.bf16.gmra.mrb[20].mxu0 %vm176_vm0, %v1564_v19  ;;  %1528 = vmatmul.mubr.msk.bf16.gmra.mrb[20].mxu1 %vm176_vm0, %v1570_v20 }
  0x3b   :  { %317 = vmatprep.mubr.bf16.mxu0 %v1793_v2  ;;  %397 = vmatprep.mubr.bf16.mxu1 %v1793_v2 }
  0x42   :  { %1521 = vmatmul.mubr.msk.bf16.gmra.mrb[24].mxu0 %vm176_vm0, %v1566_v21  ;;  %1529 = vmatmul.mubr.msk.bf16.gmra.mrb[24].mxu1 %vm176_vm0, %v1571_v22 }
  0x43   :  { %327 = vmatprep.mubr.bf16.mxu0 %v1793_v2  ;;  %407 = vmatprep.mubr.bf16.mxu1 %v1793_v2 }
  0x4a   :  { %1522 = vmatmul.mubr.msk.bf16.gmra.mrb[28].mxu0 %vm176_vm0, %v1568_v23  ;;  %1530 = vmatmul.mubr.msk.bf16.gmra.mrb[28].mxu1 %vm176_vm0, %v1572_v24 }
  0xe5   :  { %v1922_v25 = vpop.f32.mrb[0].mxu0  ;;  %v1924_v26 = vpop.f32.mrb[0].mxu1 }
  0xe6   :  { %v1926_v27 = vpop.f32.mrb[1].mxu0  ;;  %v1928_v28 = vpop.f32.mrb[1].mxu1  ;;  %v492_v31 = vmul.f32 %v1922_v25, %v1922_v25 }
  0xe7   :  { %v1930_v29 = vpop.f32.mrb[2].mxu0  ;;  %v1932_v30 = vpop.f32.mrb[2].mxu1  ;;  %v493_v36 = vmul.f32 %v1926_v27, %v1926_v27 }
  0xe8   :  { %v418_v32 = vadd.f32 %v1930_v29, %v1922_v25  ;;  %v494_v33 = vmul.f32 %v1930_v29, %v1930_v29  ;;  %v1940_v34 = vpop.f32.mrb[3].mxu0  ;;  %v1942_v35 = vpop.f32.mrb[3].mxu1 }
  0xe9   :  { %v455_v37 = vadd.f32 %v1940_v34, %v1926_v27  ;;  %v495_v38 = vmul.f32 %v1940_v34, %v1940_v34 }
  0xea   :  { %v556_v39 = vadd.f32 %v494_v33, %v492_v31 }
  0xeb   :  { %v593_v40 = vadd.f32 %v495_v38, %v493_v36 }
  0xed   :  { %v1950_v41 = vpop.f32.mrb[4].mxu0  ;;  %v1952_v42 = vpop.f32.mrb[4].mxu1 }
  0xee   :  { %v419_v43 = vadd.f32 %v418_v32, %v1950_v41  ;;  %v496_v44 = vmul.f32 %v1950_v41, %v1950_v41  ;;  %v1957_v45 = vpop.f32.mrb[5].mxu0  ;;  %v1959_v46 = vpop.f32.mrb[5].mxu1 }
  0xef   :  { %v456_v47 = vadd.f32 %v455_v37, %v1957_v45  ;;  %v497_v48 = vmul.f32 %v1957_v45, %v1957_v45  ;;  %v1964_v49 = vpop.f32.mrb[6].mxu0  ;;  %v1966_v50 = vpop.f32.mrb[6].mxu1 }
  0xf0   :  { %v557_v51 = vadd.f32 %v556_v39, %v496_v44  ;;  %v420_v52 = vadd.f32 %v419_v43, %v1964_v49  ;;  %v498_v53 = vmul.f32 %v1964_v49, %v1964_v49  ;;  %v1971_v54 = vpop.f32.mrb[7].mxu0  ;;  %v1973_v55 = vpop.f32.mrb[7].mxu1 }
  0xf1   :  { %v594_v56 = vadd.f32 %v593_v40, %v497_v48  ;;  %v457_v57 = vadd.f32 %v456_v47, %v1971_v54  ;;  %v499_v58 = vmul.f32 %v1971_v54, %v1971_v54 }
  0xf2   :  { %v558_v59 = vadd.f32 %v557_v51, %v498_v53 }
  0xf3   :  { %v595_v60 = vadd.f32 %v594_v56, %v499_v58 }
  0xf5   :  { %v1978_v61 = vpop.f32.mrb[8].mxu0  ;;  %v1980_v62 = vpop.f32.mrb[8].mxu1 }
  0xf6   :  { %v421_v63 = vadd.f32 %v420_v52, %v1978_v61  ;;  %v500_v0 = vmul.f32 %v1978_v61, %v1978_v61  ;;  %v1985_v1 = vpop.f32.mrb[9].mxu0  ;;  %v1987_v2 = vpop.f32.mrb[9].mxu1 }
  0xf7   :  { %v458_v3 = vadd.f32 %v457_v57, %v1985_v1  ;;  %v501_v4 = vmul.f32 %v1985_v1, %v1985_v1  ;;  %v1992_v5 = vpop.f32.mrb[10].mxu0  ;;  %v1994_v6 = vpop.f32.mrb[10].mxu1 }
  0xf8   :  { %v559_v7 = vadd.f32 %v558_v59, %v500_v0  ;;  %v422_v8 = vadd.f32 %v421_v63, %v1992_v5  ;;  %v502_v9 = vmul.f32 %v1992_v5, %v1992_v5  ;;  %v1999_v10 = vpop.f32.mrb[11].mxu0  ;;  %v2001_v11 = vpop.f32.mrb[11].mxu1 }
  0xf9   :  { %v596_v12 = vadd.f32 %v595_v60, %v501_v4  ;;  %v459_v13 = vadd.f32 %v458_v3, %v1999_v10  ;;  %v503_v14 = vmul.f32 %v1999_v10, %v1999_v10 }
  0xfa   :  { %v560_v15 = vadd.f32 %v559_v7, %v502_v9 }
  0xfb   :  { %v597_v16 = vadd.f32 %v596_v12, %v503_v14 }
  0xfd   :  { %v2006_v17 = vpop.f32.mrb[12].mxu0  ;;  %v2008_v18 = vpop.f32.mrb[12].mxu1 }
  0xfe   :  { %v423_v19 = vadd.f32 %v422_v8, %v2006_v17  ;;  %v504_v20 = vmul.f32 %v2006_v17, %v2006_v17  ;;  %v2013_v21 = vpop.f32.mrb[13].mxu0  ;;  %v2015_v22 = vpop.f32.mrb[13].mxu1 }
  0xff   :  { %v460_v23 = vadd.f32 %v459_v13, %v2013_v21  ;;  %v505_v24 = vmul.f32 %v2013_v21, %v2013_v21  ;;  %v2020_v31 = vpop.f32.mrb[14].mxu0  ;;  %v2022_v32 = vpop.f32.mrb[14].mxu1 }
 0x100   :  { %3270 = vst [vmem:[#allocation5_spill] sm:$0xff] %v2020_v31  ;;  %v561_v33 = vadd.f32 %v560_v15, %v504_v20  ;;  %v424_v36 = vadd.f32 %v423_v19, %v2020_v31  ;;  %v506_v37 = vmul.f32 %v2020_v31, %v2020_v31  ;;  %v2027_v38 = vpop.f32.mrb[15].mxu0  ;;  %v2029_v39 = vpop.f32.mrb[15].mxu1 }
 0x101   :  { %3271 = vst [vmem:[#allocation6_spill] sm:$0xff] %v2027_v38  ;;  %v598_v40 = vadd.f32 %v597_v16, %v505_v24  ;;  %v461_v43 = vadd.f32 %v460_v23, %v2027_v38  ;;  %v507_v44 = vmul.f32 %v2027_v38, %v2027_v38 }
 0x102   :  { %v562_v47 = vadd.f32 %v561_v33, %v506_v37 }
 0x103   :  { %v599_v48 = vadd.f32 %v598_v40, %v507_v44 }
 0x105   :  { %v2034_v51 = vpop.f32.mrb[16].mxu0  ;;  %v2036_v52 = vpop.f32.mrb[16].mxu1 }
 0x106   :  { %3272 = vst [vmem:[#allocation7_spill] sm:$0xff] %v2034_v51  ;;  %v425_v53 = vadd.f32 %v424_v36, %v2034_v51  ;;  %v508_v56 = vmul.f32 %v2034_v51, %v2034_v51  ;;  %v2041_v57 = vpop.f32.mrb[17].mxu0  ;;  %v2043_v58 = vpop.f32.mrb[17].mxu1 }
 0x107   :  { %3273 = vst [vmem:[#allocation8_spill] sm:$0xff] %v2041_v57  ;;  %v462_v59 = vadd.f32 %v461_v43, %v2041_v57  ;;  %v509_v60 = vmul.f32 %v2041_v57, %v2041_v57  ;;  %v2048_v63 = vpop.f32.mrb[18].mxu0  ;;  %v2050_v0 = vpop.f32.mrb[18].mxu1  ;;  %v524_v57 = vmul.f32 %v1924_v26, %v1924_v26 }
 0x108   :  { %3274 = vst [vmem:[#allocation9_spill] sm:$0xff] %v2048_v63  ;;  %v563_v3 = vadd.f32 %v562_v47, %v508_v56  ;;  %v426_v4 = vadd.f32 %v425_v53, %v2048_v63  ;;  %v510_v7 = vmul.f32 %v2048_v63, %v2048_v63  ;;  %v2055_v8 = vpop.f32.mrb[19].mxu0  ;;  %v2057_v9 = vpop.f32.mrb[19].mxu1 }
 0x109   :  { %3275 = vst [vmem:[#allocation10_spill] sm:$0xff] %v2055_v8  ;;  %v600_v12 = vadd.f32 %v599_v48, %v509_v60  ;;  %v463_v13 = vadd.f32 %v462_v59, %v2055_v8  ;;  %v511_v14 = vmul.f32 %v2055_v8, %v2055_v8 }
 0x10a   :  { %v564_v15 = vadd.f32 %v563_v3, %v510_v7 }
 0x10b   :  { %v601_v16 = vadd.f32 %v600_v12, %v511_v14 }
 0x10d   :  { %v2062_v19 = vpop.f32.mrb[20].mxu0  ;;  %v2064_v20 = vpop.f32.mrb[20].mxu1 }
 0x10e   :  { %3276 = vst [vmem:[#allocation11_spill] sm:$0xff] %v2062_v19  ;;  %v427_v23 = vadd.f32 %v426_v4, %v2062_v19  ;;  %v512_v24 = vmul.f32 %v2062_v19, %v2062_v19  ;;  %v2069_v33 = vpop.f32.mrb[21].mxu0  ;;  %v2071_v36 = vpop.f32.mrb[21].mxu1 }
 0x10f   :  { %3277 = vst [vmem:[#allocation12_spill] sm:$0xff] %v2069_v33  ;;  %v464_v37 = vadd.f32 %v463_v13, %v2069_v33  ;;  %v513_v40 = vmul.f32 %v2069_v33, %v2069_v33  ;;  %v2076_v43 = vpop.f32.mrb[22].mxu0  ;;  %v2078_v44 = vpop.f32.mrb[22].mxu1 }
 0x110   :  { %3278 = vst [vmem:[#allocation13_spill] sm:$0xff] %v2076_v43  ;;  %3279 = vst [vmem:[#allocation14_spill] sm:$0xff] %v2078_v44  ;;  %v565_v47 = vadd.f32 %v564_v15, %v512_v24  ;;  %v428_v48 = vadd.f32 %v427_v23, %v2076_v43  ;;  %v514_v53 = vmul.f32 %v2076_v43, %v2076_v43  ;;  %v2083_v56 = vpop.f32.mrb[23].mxu0  ;;  %v2085_v59 = vpop.f32.mrb[23].mxu1 }
 0x111   :  { %3280 = vst [vmem:[#allocation15_spill] sm:$0xff] %v2083_v56  ;;  %3281 = vst [vmem:[#allocation16_spill] sm:$0xff] %v2085_v59  ;;  %v602_v60 = vadd.f32 %v601_v16, %v513_v40  ;;  %v465_v3 = vadd.f32 %v464_v37, %v2083_v56  ;;  %v515_v4 = vmul.f32 %v2083_v56, %v2083_v56 }
 0x112   :  { %v566_v7 = vadd.f32 %v565_v47, %v514_v53 }
 0x113   :  { %v603_v12 = vadd.f32 %v602_v60, %v515_v4 }
 0x115   :  { %v2090_v13 = vpop.f32.mrb[24].mxu0  ;;  %v2092_v14 = vpop.f32.mrb[24].mxu1 }
 0x116   :  { %3282 = vst [vmem:[#allocation17_spill] sm:$0xff] %v2090_v13  ;;  %3283 = vst [vmem:[#allocation18_spill] sm:$0xff] %v2092_v14  ;;  %v429_v15 = vadd.f32 %v428_v48, %v2090_v13  ;;  %v516_v23 = vmul.f32 %v2090_v13, %v2090_v13  ;;  %v2097_v24 = vpop.f32.mrb[25].mxu0  ;;  %v2099_v43 = vpop.f32.mrb[25].mxu1 }
 0x117   :  { %3284 = vst [vmem:[#allocation19_spill] sm:$0xff] %v2097_v24  ;;  %3285 = vst [vmem:[#allocation20_spill] sm:$0xff] %v2099_v43  ;;  %v466_v16 = vadd.f32 %v465_v3, %v2097_v24  ;;  %v517_v37 = vmul.f32 %v2097_v24, %v2097_v24  ;;  %v2104_v40 = vpop.f32.mrb[26].mxu0  ;;  %v2106_v47 = vpop.f32.mrb[26].mxu1 }
 0x118   :  { %3286 = vst [vmem:[#allocation21_spill] sm:$0xff] %v2104_v40  ;;  %3287 = vst [vmem:[#allocation22_spill] sm:$0xff] %v2106_v47  ;;  %v567_v53 = vadd.f32 %v566_v7, %v516_v23  ;;  %v430_v60 = vadd.f32 %v429_v15, %v2104_v40  ;;  %v518_v48 = vmul.f32 %v2104_v40, %v2104_v40  ;;  %v2111_v4 = vpop.f32.mrb[27].mxu0  ;;  %v2113_v13 = vpop.f32.mrb[27].mxu1 }
 0x119   :  { %3288 = vst [vmem:[#allocation23_spill] sm:$0xff] %v2111_v4  ;;  %3289 = vst [vmem:[#allocation24_spill] sm:$0xff] %v2113_v13  ;;  %v604_v56 = vadd.f32 %v603_v12, %v517_v37  ;;  %v467_v3 = vadd.f32 %v466_v16, %v2111_v4  ;;  %v519_v24 = vmul.f32 %v2111_v4, %v2111_v4 }
 0x11a   :  { %v568_v33 = vadd.f32 %v567_v53, %v518_v48 }
 0x11b   :  { %v605_v19 = vadd.f32 %v604_v56, %v519_v24 }
 0x11d   :  { %v2118_v8 = vpop.f32.mrb[28].mxu0  ;;  %v2120_v7 = vpop.f32.mrb[28].mxu1 }
 0x11e   :  { %3290 = vst [vmem:[#allocation25_spill] sm:$0xff] %v2118_v8  ;;  %3291 = vst [vmem:[#allocation26_spill] sm:$0xff] %v2120_v7  ;;  %v431_v15 = vadd.f32 %v430_v60, %v2118_v8  ;;  %v520_v23 = vmul.f32 %v2118_v8, %v2118_v8  ;;  %v2125_v40 = vpop.f32.mrb[29].mxu0  ;;  %v2127_v63 = vpop.f32.mrb[29].mxu1 }
 0x11f   :  { %3292 = vst [vmem:[#allocation27_spill] sm:$0xff] %v2125_v40  ;;  %3293 = vst [vmem:[#allocation28_spill] sm:$0xff] %v2127_v63  ;;  %v468_v12 = vadd.f32 %v467_v3, %v2125_v40  ;;  %v521_v16 = vmul.f32 %v2125_v40, %v2125_v40  ;;  %v2132_v37 = vpop.f32.mrb[30].mxu0  ;;  %v2134_v56 = vpop.f32.mrb[30].mxu1 }
 0x120   :  { %3294 = vst [vmem:[#allocation29_spill] sm:$0xff] %v2132_v37  ;;  %3295 = vst [vmem:[#allocation30_spill] sm:$0xff] %v2134_v56  ;;  %v569_v24 = vadd.f32 %v568_v33, %v520_v23  ;;  %v432_v53 = vadd.f32 %v431_v15, %v2132_v37  ;;  %v522_v60 = vmul.f32 %v2132_v37, %v2132_v37  ;;  %v2139_v48 = vpop.f32.mrb[31].mxu0  ;;  %v2141_v8 = vpop.f32.mrb[31].mxu1 }
 0x121   :  { %3296 = vst [vmem:[#allocation31_spill] sm:$0xff] %v2139_v48  ;;  %v606_v4 = vadd.f32 %v605_v19, %v521_v16  ;;  %v469_v3 = vadd.f32 %v468_v12, %v2139_v48  ;;  %v523_v40 = vmul.f32 %v2139_v48, %v2139_v48  ;;  %v525_v15 = vmul.f32 %v1928_v28, %v1928_v28 }
 0x122   :  { %v433_v33 = vadd.f32 %v432_v53, %v1924_v26  ;;  %v570_v23 = vadd.f32 %v569_v24, %v522_v60  ;;  %v526_v19 = vmul.f32 %v1932_v30, %v1932_v30  ;;  %v527_v48 = vmul.f32 %v1942_v35, %v1942_v35 }
 0x123   :  { %v470_v37 = vadd.f32 %v469_v3, %v1928_v28  ;;  %v607_v51 = vadd.f32 %v606_v4, %v523_v40  ;;  %v528_v24 = vmul.f32 %v1952_v42, %v1952_v42  ;;  %v529_v40 = vmul.f32 %v1959_v46, %v1959_v46 }
 0x124   :  { %v434_v12 = vadd.f32 %v433_v33, %v1932_v30  ;;  %v571_v16 = vadd.f32 %v570_v23, %v524_v57  ;;  %v530_v57 = vmul.f32 %v1966_v50, %v1966_v50 }
 0x125   :  { %v471_v38 = vadd.f32 %v470_v37, %v1942_v35  ;;  %v608_v31 = vadd.f32 %v607_v51, %v525_v15  ;;  %v531_v51 = vmul.f32 %v1973_v55, %v1973_v55 }
 0x126   :  { %v435_v53 = vadd.f32 %v434_v12, %v1952_v42  ;;  %v572_v60 = vadd.f32 %v571_v16, %v526_v19  ;;  %v532_v19 = vmul.f32 %v1980_v62, %v1980_v62 }
 0x127   :  { %v472_v4 = vadd.f32 %v471_v38, %v1959_v46  ;;  %v609_v3 = vadd.f32 %v608_v31, %v527_v48  ;;  %v533_v31 = vmul.f32 %v1987_v2, %v1987_v2 }
 0x128   :  { %v436_v33 = vadd.f32 %v435_v53, %v1966_v50  ;;  %v573_v23 = vadd.f32 %v572_v60, %v528_v24  ;;  %v534_v24 = vmul.f32 %v1994_v6, %v1994_v6 }
 0x129   :  { %v473_v37 = vadd.f32 %v472_v4, %v1973_v55  ;;  %v610_v15 = vadd.f32 %v609_v3, %v529_v40  ;;  %v535_v40 = vmul.f32 %v2001_v11, %v2001_v11 }
 0x12a   :  { %v574_v12 = vadd.f32 %v573_v23, %v530_v57  ;;  %v437_v16 = vadd.f32 %v436_v33, %v1980_v62  ;;  %v536_v57 = vmul.f32 %v2008_v18, %v2008_v18 }
 0x12b   :  { %v611_v38 = vadd.f32 %v610_v15, %v531_v51  ;;  %v474_v48 = vadd.f32 %v473_v37, %v1987_v2  ;;  %v537_v51 = vmul.f32 %v2015_v22, %v2015_v22 }
 0x12c   :  { %v438_v53 = vadd.f32 %v437_v16, %v1994_v6  ;;  %v575_v60 = vadd.f32 %v574_v12, %v532_v19  ;;  %v538_v19 = vmul.f32 %v2022_v32, %v2022_v32 }
 0x12d   :  { %v475_v4 = vadd.f32 %v474_v48, %v2001_v11  ;;  %v612_v3 = vadd.f32 %v611_v38, %v533_v31  ;;  %v539_v31 = vmul.f32 %v2029_v39, %v2029_v39 }
 0x12e   :  { %v439_v33 = vadd.f32 %v438_v53, %v2008_v18  ;;  %v576_v23 = vadd.f32 %v575_v60, %v534_v24  ;;  %v540_v53 = vmul.f32 %v2036_v52, %v2036_v52 }
 0x12f   :  { %v476_v37 = vadd.f32 %v475_v4, %v2015_v22  ;;  %v613_v15 = vadd.f32 %v612_v3, %v535_v40  ;;  %v541_v4 = vmul.f32 %v2043_v58, %v2043_v58 }
 0x130   :  { %v440_v12 = vadd.f32 %v439_v33, %v2022_v32  ;;  %v577_v16 = vadd.f32 %v576_v23, %v536_v57  ;;  %v542_v23 = vmul.f32 %v2050_v0, %v2050_v0 }
 0x131   :  { %v477_v38 = vadd.f32 %v476_v37, %v2029_v39  ;;  %v614_v48 = vadd.f32 %v613_v15, %v537_v51  ;;  %v543_v15 = vmul.f32 %v2057_v9, %v2057_v9 }
 0x132   :  { %v441_v24 = vadd.f32 %v440_v12, %v2036_v52  ;;  %v578_v60 = vadd.f32 %v577_v16, %v538_v19  ;;  %v544_v16 = vmul.f32 %v2064_v20, %v2064_v20 }
 0x133   :  { %v478_v40 = vadd.f32 %v477_v38, %v2043_v58  ;;  %v615_v3 = vadd.f32 %v614_v48, %v539_v31  ;;  %v545_v48 = vmul.f32 %v2071_v36, %v2071_v36 }
 0x134   :  { %v579_v33 = vadd.f32 %v578_v60, %v540_v53  ;;  %v442_v57 = vadd.f32 %v441_v24, %v2050_v0  ;;  %v546_v60 = vmul.f32 %v2078_v44, %v2078_v44 }
 0x135   :  { %v616_v37 = vadd.f32 %v615_v3, %v541_v4  ;;  %v479_v51 = vadd.f32 %v478_v40, %v2057_v9  ;;  %v547_v3 = vmul.f32 %v2085_v59, %v2085_v59 }
 0x136   :  { %v580_v12 = vadd.f32 %v579_v33, %v542_v23  ;;  %v443_v19 = vadd.f32 %v442_v57, %v2064_v20  ;;  %v548_v23 = vmul.f32 %v2092_v14, %v2092_v14 }
 0x137   :  { %v617_v38 = vadd.f32 %v616_v37, %v543_v15  ;;  %v480_v31 = vadd.f32 %v479_v51, %v2071_v36  ;;  %v549_v15 = vmul.f32 %v2099_v43, %v2099_v43 }
 0x138   :  { %v581_v24 = vadd.f32 %v580_v12, %v544_v16  ;;  %v444_v53 = vadd.f32 %v443_v19, %v2078_v44  ;;  %v550_v16 = vmul.f32 %v2106_v47, %v2106_v47 }
 0x139   :  { %v618_v40 = vadd.f32 %v617_v38, %v545_v48  ;;  %v481_v4 = vadd.f32 %v480_v31, %v2085_v59  ;;  %v552_v38 = vmul.f32 %v2120_v7, %v2120_v7 }
 0x13a   :  { %v582_v33 = vadd.f32 %v581_v24, %v546_v60  ;;  %v445_v57 = vadd.f32 %v444_v53, %v2092_v14  ;;  %v551_v24 = vmul.f32 %v2113_v13, %v2113_v13  ;;  %v553_v53 = vmul.f32 %v2127_v63, %v2127_v63 }
 0x13b   :  { %v619_v37 = vadd.f32 %v618_v40, %v547_v3  ;;  %v482_v51 = vadd.f32 %v481_v4, %v2099_v43 }
 0x13c   :  { %v583_v12 = vadd.f32 %v582_v33, %v548_v23  ;;  %v446_v19 = vadd.f32 %v445_v57, %v2106_v47  ;;  %v554_v23 = vmul.f32 %v2134_v56, %v2134_v56 }
 0x13d   :  { %v620_v31 = vadd.f32 %v619_v37, %v549_v15  ;;  %v483_v48 = vadd.f32 %v482_v51, %v2113_v13  ;;  %v555_v15 = vmul.f32 %v2141_v8, %v2141_v8 }
 0x13e   :  { %v584_v60 = vadd.f32 %v583_v12, %v550_v16  ;;  %v447_v40 = vadd.f32 %v446_v19, %v2120_v7 }
 0x13f   :  { %v621_v4 = vadd.f32 %v620_v31, %v551_v24  ;;  %v484_v3 = vadd.f32 %v483_v48, %v2127_v63 }
 0x140   :  { %v585_v33 = vadd.f32 %v584_v60, %v552_v38  ;;  %v448_v57 = vadd.f32 %v447_v40, %v2134_v56 }
 0x141   :  { %v622_v37 = vadd.f32 %v621_v4, %v553_v53  ;;  %v485_v51 = vadd.f32 %v484_v3, %v2141_v8 }
 0x142   :  { %v449_v13 = vrot.slane %v448_v57, 4  ;;  %v586_v47 = vadd.f32 %v585_v33, %v554_v23 }
 0x143   :  { %v486_v12 = vrot.slane %v485_v51, 4  ;;  %v623_v16 = vadd.f32 %v622_v37, %v555_v15 }
 0x144   :  { %v450_v19 = vadd.f32 %v449_v13, %v448_v57  ;;  %v587_v31 = vrot.slane %v586_v47, 4 }
 0x145   :  { %v487_v24 = vadd.f32 %v486_v12, %v485_v51  ;;  %v624_v48 = vrot.slane %v623_v16, 4 }
 0x146   :  { %v451_v38 = vrot.slane %v450_v19, 2  ;;  %v588_v60 = vadd.f32 %v587_v31, %v586_v47 }
 0x147   :  { %v488_v40 = vrot.slane %v487_v24, 2  ;;  %v625_v63 = vadd.f32 %v624_v48, %v623_v16 }
 0x148   :  { %v452_v7 = vadd.f32 %v451_v38, %v450_v19  ;;  %v589_v56 = vrot.slane %v588_v60, 2 }
 0x149   :  { %v489_v53 = vadd.f32 %v488_v40, %v487_v24  ;;  %v626_v4 = vrot.slane %v625_v63, 2 }
 0x14a   :  { %v453_v3 = vrot.slane %v452_v7, 1  ;;  %v590_v43 = vadd.f32 %v589_v56, %v588_v60  ;;  %v1794_v56 = vmov 1966171168  }
 0x14b   :  { %v490_v14 = vrot.slane %v489_v53, 1  ;;  %v627_v59 = vadd.f32 %v626_v4, %v625_v63  ;;  %v649_v63 = vunpack.c.l.s4 %v1794_v56  ;;  %v638_v4 = vld [vmem:[%s3200_s2] ss:$2 sm:$0x3]  ;;  %v3299_v56 = vld [vmem:[#allocation6_spill] sm:$0xff] }
 0x14c   :  { %v454_v44 = vadd.f32 %v453_v3, %v452_v7  ;;  %v591_v33 = vrot.slane %v590_v43, 1  ;;  %v651_v7 = vlaneseq }
 0x14d   :  { %v491_v23 = vadd.f32 %v490_v14, %v489_v53  ;;  %v628_v37 = vrot.slane %v627_v59, 1  ;;  %v650_v60 = vunpack.c.0.s8 %v649_v63  ;;  %v3300_v63 = vld [vmem:[#allocation7_spill] sm:$0xff] }
 0x14e   :  { %v592_v13 = vadd.f32 %v591_v33, %v590_v43  ;;  %v630_v57 = vmul.f32 0.00390625, %v454_v44  ;;  %v652_v14 = vshrl.u32 %v651_v7, 7  ;;  %v3301_v7 = vld [vmem:[#allocation8_spill] sm:$0xff] }
 0x14f   :  { %v629_v51 = vadd.f32 %v628_v37, %v627_v59  ;;  %v631_v15 = vmul.f32 0.00390625, %v491_v23 }
 0x150   :  { %v632_v12 = vmul.f32 0.00390625, %v592_v13  ;;  %v634_v47 = vmul.f32 %v630_v57, %v630_v57  ;;  %v653_v43 = vsub.s32 %v650_v60, %v652_v14  ;;  %v667_v33 = vsub.s32 0, %v652_v14  ;;  %v3302_v60 = vld [vmem:[#allocation9_spill] sm:$0xff] }
 0x151   :  { %v633_v31 = vmul.f32 0.00390625, %v629_v51  ;;  %v635_v16 = vmul.f32 %v631_v15, %v631_v15  ;;  %v671_v23 = vsub.s32 1, %v652_v14 }
 0x152   :  { %v636_v19 = vsub.f32 %v632_v12, %v634_v47 }
 0x153   :  { %v637_v48 = vsub.f32 %v633_v31, %v635_v16 }
 0x154   :  { %v641_v24 = vadd.f32 1e-05, %v636_v19 }
 0x155   :  { %v642_v38 = vadd.f32 1e-05, %v637_v48 }
 0x156   :  { %1573 = vrsqrt.f32 %v641_v24 }
 0x157   :  { %1575 = vrsqrt.f32 %v642_v38  ;;  %v3298_v38 = vld [vmem:[#allocation5_spill] sm:$0xff] }
 0x160   :  { %v1574_v40 = vpop.eup %1573 }
 0x161   :  { %v1576_v44 = vpop.eup %1575 }
 0x162   :  { %v647_v59 = vcombine.low %v1574_v40, %v1576_v44  ;;  %v3303_v44 = vld [vmem:[#allocation10_spill] sm:$0xff] }
 0x164   :  { %v654_v53 = vrot.slane %v647_v59, %v653_v43 }
 0x166   :  { %v661_v3 = vrot.slane %v654_v53, %v653_v43  ;;  %v3304_v53 = vld [vmem:[#allocation11_spill] sm:$0xff] }
 0x168   :  { %v663_v37 = vmul.f32 %v661_v3, %v638_v4  ;;  %v3305_v3 = vld [vmem:[#allocation12_spill] sm:$0xff] }
 0x16a   :  { %v2245_v13 = vrot.slane %v663_v37, %v667_v33  ;;  %v2247_v51 = vrot.slane %v663_v37, %v671_v23 }
 0x16c   :  { %v675_v12 = vmul.f32 %v2245_v13, %v630_v57  ;;  %v676_v47 = vmul.f32 %v2247_v51, %v631_v15  ;;  %v2253_v31 = vmul.f32 %v2247_v51, %v2141_v8  ;;  %v2257_v16 = vmul.f32 %v2245_v13, %v1922_v25 }
 0x16d   :  { %v2261_v19 = vmul.f32 %v2247_v51, %v1926_v27  ;;  %v2265_v48 = vmul.f32 %v2245_v13, %v1930_v29  ;;  %v2269_v57 = vmul.f32 %v2247_v51, %v1940_v34  ;;  %v2273_v8 = vmul.f32 %v2245_v13, %v1950_v41 }
 0x16e   :  { %3297 = vst [vmem:[#allocation32_spill] sm:$0xff] %v2253_v31  ;;  %v679_v15 = vcombine.low %v675_v12, %v676_v47  ;;  %v2277_v25 = vmul.f32 %v2247_v51, %v1957_v45  ;;  %v2281_v27 = vmul.f32 %v2245_v13, %v1964_v49  ;;  %v2285_v29 = vmul.f32 %v2247_v51, %v1971_v54  ;;  %v3306_v12 = vld [vmem:[#allocation13_spill] sm:$0xff]  ;;  %v3314_v31 = vld [vmem:[#allocation27_spill] sm:$0xff] }
 0x16f   :  { %v2289_v34 = vmul.f32 %v2245_v13, %v1978_v61  ;;  %v2293_v41 = vmul.f32 %v2247_v51, %v1985_v1  ;;  %v2297_v45 = vmul.f32 %v2245_v13, %v1992_v5  ;;  %v2301_v49 = vmul.f32 %v2247_v51, %v1999_v10  ;;  %v1531_v5 = vld [vmem:[%s3200_s2 + $0x1] ss:$2 sm:$0x3]  ;;  %s1795_s2 = smov [#allocation2]  }
 0x170   :  { %v686_v24 = vrot.slane %v679_v15, %v653_v43  ;;  %v2305_v54 = vmul.f32 %v2245_v13, %v2006_v17  ;;  %v2309_v61 = vmul.f32 %v2247_v51, %v2013_v21  ;;  %v2313_v1 = vmul.f32 %v2245_v13, %v3298_v38  ;;  %v3307_v15 = vld [vmem:[#allocation15_spill] sm:$0xff]  ;;  %s1480_s7 = sshll.u32 %s1795_s2, 4  ;;  %s1481_s7 = int_to_ptr.vmem [resolvable:$true] %s1480_s7 }
 0x171   :  { %v2320_v10 = vmul.f32 %v2247_v51, %v3299_v56  ;;  %v2324_v17 = vmul.f32 %v2245_v13, %v3300_v63  ;;  %v2328_v21 = vmul.f32 %v2247_v51, %v3301_v7  ;;  %v2332_v14 = vmul.f32 %v2245_v13, %v3302_v60  ;;  %v3310_v56 = vld [vmem:[#allocation19_spill] sm:$0xff]  ;;  %v3311_v60 = vld [vmem:[#allocation21_spill] sm:$0xff]  ;;  %s1769_s8 = scalar_lea.vmem %s1481_s7, 8192  ;;  %p1774_p1 = scmp.lt.s32.totalorder %s1481_s7, %s1481_s7 }
 0x172   :  { %v693_v40 = vrot.slane %v686_v24, %v653_v43  ;;  %v2336_v59 = vmul.f32 %v2247_v51, %v3303_v44  ;;  %v2340_v4 = vmul.f32 %v2245_v13, %v3304_v53  ;;  %v2344_v37 = vmul.f32 %v2247_v51, %v3305_v3  ;;  %v3308_v43 = vld [vmem:[#allocation17_spill] sm:$0xff]  ;;  %v3312_v53 = vld [vmem:[#allocation23_spill] sm:$0xff]  ;;  %p1770_p0 = scmp.ne.s32.totalorder %s1481_s7, %s1769_s8  ;;  %p1775_p2 = scmp.lt.s32.totalorder %s1769_s8, %s1769_s8 }
 0x173   :  { %v2348_v47 = vmul.f32 %v2245_v13, %v3306_v12  ;;  %v2352_v38 = vmul.f32 %v2247_v51, %v3307_v15  ;;  %v2356_v24 = vmul.f32 %v2245_v13, %v3308_v43  ;;  %v2360_v63 = vmul.f32 %v2247_v51, %v3310_v56  ;;  %v3313_v12 = vld [vmem:[#allocation25_spill] sm:$0xff] }
 0x174   :  { %v695_v7 = vsub.f32 %v1531_v5, %v693_v40  ;;  %v2364_v44 = vmul.f32 %v2245_v13, %v3311_v60  ;;  %v2368_v3 = vmul.f32 %v2247_v51, %v3312_v53  ;;  %v2372_v15 = vmul.f32 %v2245_v13, %v3313_v12  ;;  %v3316_v5 = vld [vmem:[#allocation31_spill] sm:$0xff]  ;;  %p1776_p3 = por %p1775_p2, %p1774_p1 }
 0x175   :  { %3309 = vst [vmem:[#allocation5_spill] sm:$0xff] %v2356_v24  ;;  %v2376_v43 = vmul.f32 %v2247_v51, %v3314_v31  ;;  %v3315_v24 = vld [vmem:[#allocation29_spill] sm:$0xff]  ;;  %v2384_v40 = vmul.f32 %v2247_v51, %v3316_v5  ;;  %v2388_v60 = vmul.f32 %v2245_v13, %v1924_v26  ;;  %v2396_v31 = vmul.f32 %v2247_v51, %v1928_v28 }
 0x176   :  { %v2380_v56 = vmul.f32 %v2245_v13, %v3315_v24  ;;  %v2390_v53 = vrot.slane %v695_v7, %v667_v33  ;;  %v2392_v12 = vrot.slane %v695_v7, %v671_v23  ;;  %v2400_v24 = vmul.f32 %v2245_v13, %v1932_v30  ;;  %v3321_v23 = vld [vmem:[#allocation14_spill] sm:$0xff]  ;;  %v3323_v7 = vld [vmem:[#allocation16_spill] sm:$0xff]  ;;  %p1777_p4 = pnand %p1776_p3, %p1770_p0 }
 0x177   :  { %v2404_v5 = vmul.f32 %v2247_v51, %v1942_v35  ;;  %v2408_v26 = vmul.f32 %v2245_v13, %v1952_v42  ;;  %v2412_v33 = vmul.f32 %v2247_v51, %v1959_v46  ;;  %v2416_v28 = vmul.f32 %v2245_v13, %v1966_v50 }
 0x178   :  { %v2420_v30 = vmul.f32 %v2247_v51, %v1973_v55  ;;  %v2424_v35 = vmul.f32 %v2245_v13, %v1980_v62  ;;  %v2428_v42 = vmul.f32 %v2247_v51, %v1987_v2  ;;  %v2432_v46 = vmul.f32 %v2245_v13, %v1994_v6 }
 0x179   :  { %v2436_v50 = vmul.f32 %v2247_v51, %v2001_v11  ;;  %v2440_v55 = vmul.f32 %v2245_v13, %v2008_v18  ;;  %v2444_v62 = vmul.f32 %v2247_v51, %v2015_v22  ;;  %v2448_v2 = vmul.f32 %v2245_v13, %v2022_v32 }
 0x17a   :  { %v2452_v6 = vmul.f32 %v2247_v51, %v2029_v39  ;;  %v2456_v11 = vmul.f32 %v2245_v13, %v2036_v52  ;;  %v2460_v18 = vmul.f32 %v2247_v51, %v2043_v58  ;;  %v2464_v22 = vmul.f32 %v2245_v13, %v2050_v0 }
 0x17b   :  { %v2468_v32 = vmul.f32 %v2247_v51, %v2057_v9  ;;  %v2472_v39 = vmul.f32 %v2245_v13, %v2064_v20  ;;  %v2476_v52 = vmul.f32 %v2247_v51, %v2071_v36  ;;  %v2480_v58 = vmul.f32 %v2245_v13, %v3321_v23 }
 0x17c   :  { %3317 = vst [vmem:[#allocation6_spill] sm:$0xff] %v2456_v11  ;;  %3318 = vst [vmem:[#allocation7_spill] sm:$0xff] %v2460_v18  ;;  %v2484_v0 = vmul.f32 %v2247_v51, %v3323_v7  ;;  %v3325_v18 = vld [vmem:[#allocation18_spill] sm:$0xff]  ;;  %v3327_v11 = vld [vmem:[#allocation20_spill] sm:$0xff] }
 0x17d   :  { %3319 = vst [vmem:[#allocation8_spill] sm:$0xff] %v2472_v39  ;;  %3320 = vst [vmem:[#allocation9_spill] sm:$0xff] %v2476_v52  ;;  %v2488_v9 = vmul.f32 %v2245_v13, %v3325_v18  ;;  %v2492_v20 = vmul.f32 %v2247_v51, %v3327_v11  ;;  %v3328_v39 = vld [vmem:[#allocation22_spill] sm:$0xff]  ;;  %v3329_v52 = vld [vmem:[#allocation24_spill] sm:$0xff] }
 0x17e   :  { %3322 = vst [vmem:[#allocation10_spill] sm:$0xff] %v2480_v58  ;;  %3324 = vst [vmem:[#allocation11_spill] sm:$0xff] %v2484_v0  ;;  %v2496_v36 = vmul.f32 %v2245_v13, %v3328_v39  ;;  %v2500_v23 = vmul.f32 %v2247_v51, %v3329_v52  ;;  %v3330_v58 = vld [vmem:[#allocation26_spill] sm:$0xff]  ;;  %v3331_v0 = vld [vmem:[#allocation28_spill] sm:$0xff]  ;;  %v2516_v39 = vadd.f32 %v2390_v53, %v2273_v8 }
 0x17f   :  { %3326 = vst [vmem:[#allocation12_spill] sm:$0xff] %v2488_v9  ;;  %v2504_v7 = vmul.f32 %v2245_v13, %v3330_v58  ;;  %v2508_v18 = vmul.f32 %v2247_v51, %v3331_v0  ;;  %v3332_v9 = vld [vmem:[#allocation30_spill] sm:$0xff]  ;;  %v2520_v52 = vadd.f32 %v2392_v12, %v2277_v25  ;;  %v2524_v58 = vadd.f32 %v2390_v53, %v2257_v16 }
 0x180   :  { %v2512_v11 = vmul.f32 %v2245_v13, %v3332_v9  ;;  %v2528_v51 = vadd.f32 %v2392_v12, %v2261_v19  ;;  %v2532_v13 = vadd.f32 %v2390_v53, %v2281_v27  ;;  %v2536_v8 = vadd.f32 %v2392_v12, %v2285_v29 }
 0x181   :  { %v2540_v25 = vadd.f32 %v2390_v53, %v2265_v48  ;;  %v2544_v16 = vadd.f32 %v2392_v12, %v2269_v57  ;;  %v841_v19 = vmax.f32 %v2516_v39, %v2520_v52  ;;  %v2552_v27 = vadd.f32 %v2390_v53, %v2297_v45 }
 0x182   :  { %v835_v0 = vmax.f32 %v2524_v58, %v2528_v51  ;;  %v2556_v29 = vadd.f32 %v2392_v12, %v2301_v49  ;;  %v2560_v48 = vadd.f32 %v2390_v53, %v2289_v34  ;;  %v2564_v57 = vadd.f32 %v2392_v12, %v2293_v41 }
 0x183   :  { %3333 = vst [vmem:[#allocation13_spill] sm:$0xff] %v2544_v16  ;;  %842 = vmax.xlane.f32.xlu1 %v841_v19  ;;  %v2568_v9 = vadd.f32 %v2390_v53, %v2313_v1  ;;  %v2572_v45 = vadd.f32 %v2392_v12, %v2320_v10  ;;  %v844_v49 = vmax.f32 %v2532_v13, %v2536_v8 }
 0x184   :  { %836 = vmax.xlane.f32.xlu0 %v835_v0  ;;  %v2578_v34 = vadd.f32 %v2390_v53, %v2305_v54  ;;  %v2582_v41 = vadd.f32 %v2392_v12, %v2309_v61  ;;  %v2586_v19 = vadd.f32 %v2390_v53, %v2332_v14  ;;  %v838_v1 = vmax.f32 %v2540_v25, %v2544_v16  ;;  %v3342_v16 = vld [vmem:[#allocation5_spill] sm:$0xff] }
 0x185   :  { %3334 = vst [vmem:[#allocation15_spill] sm:$0xff] %v2572_v45  ;;  %v2592_v10 = vadd.f32 %v2392_v12, %v2336_v59  ;;  %v2596_v0 = vadd.f32 %v2390_v53, %v2324_v17  ;;  %v2600_v54 = vadd.f32 %v2392_v12, %v2328_v21  ;;  %v2604_v61 = vadd.f32 %v2390_v53, %v2348_v47 }
 0x186   :  { %3335 = vst [vmem:[#allocation17_spill] sm:$0xff] %v2582_v41  ;;  %3336 = vst [vmem:[#allocation19_spill] sm:$0xff] %v2586_v19  ;;  %v2608_v14 = vadd.f32 %v2392_v12, %v2352_v38  ;;  %v2612_v59 = vadd.f32 %v2390_v53, %v2340_v4  ;;  %v2616_v17 = vadd.f32 %v2392_v12, %v2344_v37 }
 0x187   :  { %3337 = vst [vmem:[#allocation21_spill] sm:$0xff] %v2592_v10  ;;  %3338 = vst [vmem:[#allocation23_spill] sm:$0xff] %v2596_v0  ;;  %845 = vmax.xlane.f32.xlu1 %v844_v49  ;;  %v850_v21 = vmax.f32 %v2552_v27, %v2556_v29  ;;  %v2622_v47 = vadd.f32 %v2390_v53, %v2364_v44  ;;  %v2626_v38 = vadd.f32 %v2392_v12, %v2368_v3 }
 0x188   :  { %3339 = vst [vmem:[#allocation25_spill] sm:$0xff] %v2600_v54  ;;  %3340 = vst [vmem:[#allocation27_spill] sm:$0xff] %v2604_v61  ;;  %839 = vmax.xlane.f32.xlu0 %v838_v1  ;;  %v2630_v4 = vadd.f32 %v2390_v53, %v3342_v16  ;;  %v847_v49 = vmax.f32 %v2560_v48, %v2564_v57  ;;  %v2636_v37 = vadd.f32 %v2392_v12, %v2360_v63 }
 0x189   :  { %3341 = vst [vmem:[#allocation29_spill] sm:$0xff] %v2608_v14  ;;  %v2640_v1 = vadd.f32 %v2390_v53, %v2380_v56  ;;  %v2644_v44 = vadd.f32 %v2392_v12, %v2384_v40  ;;  %v2648_v3 = vadd.f32 %v2390_v53, %v2372_v15  ;;  %v2652_v16 = vadd.f32 %v2392_v12, %v2376_v43 }
 0x18a   :  { %v2656_v63 = vadd.f32 %v2390_v53, %v2400_v24  ;;  %v2660_v56 = vadd.f32 %v2392_v12, %v2404_v5  ;;  %v856_v40 = vmax.f32 %v2568_v9, %v2572_v45  ;;  %v2666_v15 = vadd.f32 %v2390_v53, %v2388_v60  ;;  %v3348_v45 = vld [vmem:[#allocation9_spill] sm:$0xff] }
 0x18b   :  { %851 = vmax.xlane.f32.xlu1 %v850_v21  ;;  %v2670_v43 = vadd.f32 %v2392_v12, %v2396_v31  ;;  %v2674_v24 = vadd.f32 %v2390_v53, %v2416_v28  ;;  %v853_v21 = vmax.f32 %v2578_v34, %v2582_v41  ;;  %v2680_v5 = vadd.f32 %v2392_v12, %v2420_v30  ;;  %v3347_v41 = vld [vmem:[#allocation8_spill] sm:$0xff] }
 0x18c   :  { %848 = vmax.xlane.f32.xlu0 %v847_v49  ;;  %v2684_v49 = vadd.f32 %v2390_v53, %v2408_v26  ;;  %v2688_v60 = vadd.f32 %v2392_v12, %v2412_v33  ;;  %v2692_v31 = vadd.f32 %v2390_v53, %v2432_v46  ;;  %v2696_v28 = vadd.f32 %v2392_v12, %v2436_v50 }
 0x18d   :  { %v2700_v30 = vadd.f32 %v2390_v53, %v2424_v35  ;;  %v2704_v26 = vadd.f32 %v2392_v12, %v2428_v42  ;;  %v862_v33 = vmax.f32 %v2586_v19, %v2592_v10  ;;  %v2710_v46 = vadd.f32 %v2390_v53, %v2448_v2 }
 0x18e   :  { %v2714_v50 = vadd.f32 %v2392_v12, %v2452_v6  ;;  %v2718_v35 = vadd.f32 %v2390_v53, %v2440_v55  ;;  %v2724_v42 = vadd.f32 %v2392_v12, %v2444_v62  ;;  %v2732_v2 = vadd.f32 %v2392_v12, %v2468_v32  ;;  %v3343_v6 = vld [vmem:[#allocation6_spill] sm:$0xff]  ;;  %v3344_v55 = vld [vmem:[#allocation7_spill] sm:$0xff] }
 0x18f   :  { %857 = vmax.xlane.f32.xlu1 %v856_v40  ;;  %v859_v40 = vmax.f32 %v2596_v0, %v2600_v54  ;;  %v2736_v10 = vadd.f32 %v2390_v53, %v3343_v6  ;;  %v2740_v19 = vadd.f32 %v2392_v12, %v3344_v55  ;;  %v3345_v54 = vld [vmem:[#allocation10_spill] sm:$0xff]  ;;  %v868_v32 = vmax.f32 %v2604_v61, %v2608_v14 }
 0x190   :  { %854 = vmax.xlane.f32.xlu0 %v853_v21  ;;  %v2728_v21 = vadd.f32 %v2390_v53, %v2464_v22  ;;  %v2744_v62 = vadd.f32 %v2390_v53, %v3345_v54  ;;  %v3346_v22 = vld [vmem:[#allocation11_spill] sm:$0xff]  ;;  %v2754_v6 = vadd.f32 %v2390_v53, %v3347_v41  ;;  %v2758_v55 = vadd.f32 %v2392_v12, %v3348_v45 }
 0x191   :  { %v2748_v0 = vadd.f32 %v2392_v12, %v3346_v22  ;;  %v2762_v54 = vadd.f32 %v2390_v53, %v2496_v36  ;;  %v3350_v22 = vld [vmem:[#allocation12_spill] sm:$0xff]  ;;  %v2776_v41 = vadd.f32 %v2392_v12, %v2492_v20  ;;  %v2780_v45 = vadd.f32 %v2390_v53, %v2512_v11 }
 0x192   :  { %v2772_v14 = vadd.f32 %v2390_v53, %v3350_v22  ;;  %v3354_v36 = vld [vmem:[#allocation32_spill] sm:$0xff]  ;;  %v2792_v22 = vadd.f32 %v2392_v12, %v2508_v18  ;;  %v874_v20 = vmax.f32 %v2622_v47, %v2626_v38  ;;  %v871_v11 = vmax.f32 %v2630_v4, %v2636_v37 }
 0x193   :  { %863 = vmax.xlane.f32.xlu1 %v862_v33  ;;  %v865_v33 = vmax.f32 %v2612_v59, %v2616_v17  ;;  %3352 = vst [vmem:[#allocation16_spill] sm:$0xff] %v2776_v41  ;;  %3353 = vst [vmem:[#allocation18_spill] sm:$0xff] %v2780_v45  ;;  %v2784_v61 = vadd.f32 %v2392_v12, %v3354_v36  ;;  %v880_v36 = vmax.f32 %v2640_v1, %v2644_v44 }
 0x194   :  { %860 = vmax.xlane.f32.xlu0 %v859_v40  ;;  %v2768_v40 = vadd.f32 %v2392_v12, %v2500_v23  ;;  %3351 = vst [vmem:[#allocation14_spill] sm:$0xff] %v2772_v14  ;;  %v2788_v23 = vadd.f32 %v2390_v53, %v2504_v7  ;;  %3357 = vst [vmem:[#allocation24_spill] sm:$0xff] %v2792_v22  ;;  %v877_v53 = vmax.f32 %v2648_v3, %v2652_v16 }
 0x195   :  { %3355 = vst [vmem:[#allocation20_spill] sm:$0xff] %v2784_v61  ;;  %v886_v12 = vmax.f32 %v2656_v63, %v2660_v56  ;;  %v883_v7 = vmax.f32 %v2666_v15, %v2670_v43  ;;  %v892_v18 = vmax.f32 %v2674_v24, %v2680_v5 }
 0x196   :  { %3349 = vst [vmem:[#allocation31_spill] sm:$0xff] %v2768_v40  ;;  %3356 = vst [vmem:[#allocation22_spill] sm:$0xff] %v2788_v23 }
 0x197   :  { %869 = vmax.xlane.f32.xlu1 %v868_v32  ;;  %v889_v32 = vmax.f32 %v2684_v49, %v2688_v60 }
 0x198   :  { %866 = vmax.xlane.f32.xlu0 %v865_v33  ;;  %v898_v33 = vmax.f32 %v2692_v31, %v2696_v28 }
 0x19b   :  { %875 = vmax.xlane.f32.xlu1 %v874_v20  ;;  %v895_v20 = vmax.f32 %v2700_v30, %v2704_v26 }
 0x19c   :  { %872 = vmax.xlane.f32.xlu0 %v871_v11  ;;  %v904_v11 = vmax.f32 %v2710_v46, %v2714_v50 }
 0x19f   :  { %881 = vmax.xlane.f32.xlu1 %v880_v36  ;;  %v901_v36 = vmax.f32 %v2718_v35, %v2724_v42 }
 0x1a0   :  { %878 = vmax.xlane.f32.xlu0 %v877_v53  ;;  %v910_v53 = vmax.f32 %v2728_v21, %v2732_v2 }
 0x1a3   :  { %887 = vmax.xlane.f32.xlu1 %v886_v12  ;;  %v907_v12 = vmax.f32 %v2736_v10, %v2740_v19 }
 0x1a4   :  { %884 = vmax.xlane.f32.xlu0 %v883_v7  ;;  %v916_v7 = vmax.f32 %v2744_v62, %v2748_v0 }
 0x1a7   :  { %893 = vmax.xlane.f32.xlu1 %v892_v18  ;;  %v913_v18 = vmax.f32 %v2754_v6, %v2758_v55 }
 0x1a8   :  { %890 = vmax.xlane.f32.xlu0 %v889_v32  ;;  %v922_v32 = vmax.f32 %v2762_v54, %v2768_v40 }
 0x1ab   :  { %899 = vmax.xlane.f32.xlu1 %v898_v33  ;;  %v919_v33 = vmax.f32 %v2772_v14, %v2776_v41 }
 0x1ac   :  { %896 = vmax.xlane.f32.xlu0 %v895_v20  ;;  %v928_v20 = vmax.f32 %v2780_v45, %v2784_v61 }
 0x1af   :  { %905 = vmax.xlane.f32.xlu1 %v904_v11  ;;  %v925_v11 = vmax.f32 %v2788_v23, %v2792_v22  ;;  %v3358_v23 = vld [vmem:[#allocation13_spill] sm:$0xff] }
 0x1b0   :  { %902 = vmax.xlane.f32.xlu0 %v901_v36 }
 0x1b3   :  { %911 = vmax.xlane.f32.xlu1 %v910_v53 }
 0x1b4   :  { %908 = vmax.xlane.f32.xlu0 %v907_v12 }
 0x1b7   :  { %917 = vmax.xlane.f32.xlu1 %v916_v7 }
 0x1b8   :  { %914 = vmax.xlane.f32.xlu0 %v913_v18 }
 0x1bb   :  { %923 = vmax.xlane.f32.xlu1 %v922_v32 }
 0x1bc   :  { %920 = vmax.xlane.f32.xlu0 %v919_v33 }
 0x1bf   :  { %929 = vmax.xlane.f32.xlu1 %v928_v20 }
 0x1c0   :  { %926 = vmax.xlane.f32.xlu0 %v925_v11 }
 0x210   :  { %v843_v36 = vpop.xlane.xlu1 %842 }
 0x211   :  { %v837_v53 = vpop.xlane.xlu0 %836  ;;  %v935_v12 = vsub.f32 %v2516_v39, %v843_v36  ;;  %v936_v41 = vsub.f32 %v2520_v52, %v843_v36 }
 0x212   :  { %v931_v7 = vsub.f32 %v2524_v58, %v837_v53  ;;  %v932_v18 = vsub.f32 %v2528_v51, %v837_v53 }
 0x213   :  { %v1003_v61 = vmul.f32 1.442695, %v935_v12  ;;  %v1005_v11 = vmul.f32 1.442695, %v936_v41 }
 0x214   :  { %v995_v32 = vmul.f32 1.442695, %v931_v7  ;;  %v997_v33 = vmul.f32 1.442695, %v932_v18  ;;  %v846_v40 = vpop.xlane.xlu1 %845 }
 0x215   :  { %v840_v14 = vpop.xlane.xlu0 %839  ;;  %v937_v45 = vsub.f32 %v2532_v13, %v846_v40  ;;  %v938_v22 = vsub.f32 %v2536_v8, %v846_v40 }
 0x216   :  { %v933_v20 = vsub.f32 %v2540_v25, %v840_v14  ;;  %v934_v39 = vsub.f32 %v3358_v23, %v840_v14  ;;  %1577 = vpow2.f32 %v995_v32  ;;  %v3360_v32 = vld [vmem:[#allocation17_spill] sm:$0xff] }
 0x217   :  { %1579 = vpow2.f32 %v997_v33  ;;  %v1007_v36 = vmul.f32 1.442695, %v937_v45  ;;  %v1009_v13 = vmul.f32 1.442695, %v938_v22  ;;  %v3359_v45 = vld [vmem:[#allocation15_spill] sm:$0xff] }
 0x218   :  { %v999_v58 = vmul.f32 1.442695, %v933_v20  ;;  %v1001_v51 = vmul.f32 1.442695, %v934_v39  ;;  %v852_v53 = vpop.xlane.xlu1 %851  ;;  %1581 = vpow2.f32 %v1003_v61 }
 0x219   :  { %v849_v52 = vpop.xlane.xlu0 %848  ;;  %v941_v7 = vsub.f32 %v2552_v27, %v852_v53  ;;  %1583 = vpow2.f32 %v1005_v11  ;;  %v942_v25 = vsub.f32 %v2556_v29, %v852_v53  ;;  %v3362_v53 = vld [vmem:[#allocation23_spill] sm:$0xff] }
 0x21a   :  { %v939_v12 = vsub.f32 %v2560_v48, %v849_v52  ;;  %v940_v8 = vsub.f32 %v2564_v57, %v849_v52  ;;  %1585 = vpow2.f32 %v999_v58 }
 0x21b   :  { %1587 = vpow2.f32 %v1001_v51  ;;  %v1015_v18 = vmul.f32 1.442695, %v941_v7  ;;  %v1017_v48 = vmul.f32 1.442695, %v942_v25  ;;  %v3361_v51 = vld [vmem:[#allocation19_spill] sm:$0xff]  ;;  %v3363_v7 = vld [vmem:[#allocation21_spill] sm:$0xff] }
 0x21c   :  { %v1011_v14 = vmul.f32 1.442695, %v939_v12  ;;  %v1013_v40 = vmul.f32 1.442695, %v940_v8  ;;  %v858_v41 = vpop.xlane.xlu1 %857  ;;  %1589 = vpow2.f32 %v1007_v36 }
 0x21d   :  { %v855_v23 = vpop.xlane.xlu0 %854  ;;  %v945_v61 = vsub.f32 %v2568_v9, %v858_v41  ;;  %1591 = vpow2.f32 %v1009_v13  ;;  %v946_v22 = vsub.f32 %v3359_v45, %v858_v41  ;;  %v3364_v13 = vld [vmem:[#allocation25_spill] sm:$0xff]  ;;  %v3365_v45 = vld [vmem:[#allocation27_spill] sm:$0xff] }
 0x21e   :  { %v943_v27 = vsub.f32 %v2578_v34, %v855_v23  ;;  %v944_v29 = vsub.f32 %v3360_v32, %v855_v23  ;;  %1593 = vpow2.f32 %v1011_v14 }
 0x21f   :  { %1595 = vpow2.f32 %v1013_v40  ;;  %v1023_v58 = vmul.f32 1.442695, %v945_v61  ;;  %v1025_v36 = vmul.f32 1.442695, %v946_v22 }
 0x220   :  { %v1019_v57 = vmul.f32 1.442695, %v943_v27  ;;  %v1021_v33 = vmul.f32 1.442695, %v944_v29  ;;  %v864_v20 = vpop.xlane.xlu1 %863  ;;  %v2850_v39 = vpop.eup %1577  ;;  %1597 = vpow2.f32 %v1015_v18 }
 0x221   :  { %v861_v11 = vpop.xlane.xlu0 %860  ;;  %v949_v9 = vsub.f32 %v3361_v51, %v864_v20  ;;  %v2854_v52 = vpop.eup %1579  ;;  %1599 = vpow2.f32 %v1017_v48  ;;  %v950_v12 = vsub.f32 %v3363_v7, %v864_v20 }
 0x222   :  { %v947_v34 = vsub.f32 %v3362_v53, %v861_v11  ;;  %v948_v25 = vsub.f32 %v3364_v13, %v861_v11  ;;  %v2858_v8 = vpop.eup %1581  ;;  %1601 = vpow2.f32 %v1019_v57  ;;  %v1123_v23 = vadd.f32 %v2854_v52, %v2850_v39 }
 0x223   :  { %v2860_v40 = vpop.eup %1583  ;;  %1603 = vpow2.f32 %v1021_v33  ;;  %v1031_v48 = vmul.f32 1.442695, %v949_v9  ;;  %v1033_v57 = vmul.f32 1.442695, %v950_v12  ;;  %v3366_v33 = vld [vmem:[#allocation29_spill] sm:$0xff] }
 0x224   :  { %v1027_v14 = vmul.f32 1.442695, %v947_v34  ;;  %v1029_v41 = vmul.f32 1.442695, %v948_v25  ;;  %v870_v18 = vpop.xlane.xlu1 %869  ;;  %v2864_v27 = vpop.eup %1585  ;;  %1605 = vpow2.f32 %v1023_v58  ;;  %1124 = vadd.xlane.f32.xlu0 %v1123_v23 }
 0x225   :  { %v867_v61 = vpop.xlane.xlu0 %866  ;;  %v953_v22 = vsub.f32 %v3365_v45, %v870_v18  ;;  %v2868_v29 = vpop.eup %1587  ;;  %1607 = vpow2.f32 %v1025_v36  ;;  %v954_v20 = vsub.f32 %v3366_v33, %v870_v18 }
 0x226   :  { %v951_v32 = vsub.f32 %v2612_v59, %v867_v61  ;;  %v952_v11 = vsub.f32 %v2616_v17, %v867_v61  ;;  %v2872_v51 = vpop.eup %1589  ;;  %1609 = vpow2.f32 %v1027_v14  ;;  %v1129_v59 = vadd.f32 %v2860_v40, %v2858_v8 }
 0x227   :  { %v2874_v34 = vpop.eup %1591  ;;  %1611 = vpow2.f32 %v1029_v41  ;;  %v1126_v9 = vadd.f32 %v2868_v29, %v2864_v27  ;;  %v1039_v17 = vmul.f32 1.442695, %v953_v22  ;;  %v1041_v41 = vmul.f32 1.442695, %v954_v20 }
 0x228   :  { %v1035_v53 = vmul.f32 1.442695, %v951_v32  ;;  %v1037_v58 = vmul.f32 1.442695, %v952_v11  ;;  %v876_v36 = vpop.xlane.xlu1 %875  ;;  %v2880_v12 = vpop.eup %1593  ;;  %1613 = vpow2.f32 %v1031_v48  ;;  %1130 = vadd.xlane.f32.xlu0 %v1129_v59 }
 0x229   :  { %v873_v7 = vpop.xlane.xlu0 %872  ;;  %v957_v13 = vsub.f32 %v2622_v47, %v876_v36  ;;  %v2884_v14 = vpop.eup %1595  ;;  %1615 = vpow2.f32 %v1033_v57  ;;  %1127 = vadd.xlane.f32.xlu1 %v1126_v9  ;;  %v958_v23 = vsub.f32 %v2626_v38, %v876_v36 }
 0x22a   :  { %v955_v25 = vsub.f32 %v2630_v4, %v873_v7  ;;  %v956_v18 = vsub.f32 %v2636_v37, %v873_v7  ;;  %v2888_v61 = vpop.eup %1597  ;;  %1617 = vpow2.f32 %v1035_v53  ;;  %v1132_v4 = vadd.f32 %v2874_v34, %v2872_v51 }
 0x22b   :  { %v2890_v48 = vpop.eup %1599  ;;  %1619 = vpow2.f32 %v1037_v58  ;;  %v1135_v22 = vadd.f32 %v2884_v14, %v2880_v12  ;;  %v1047_v38 = vmul.f32 1.442695, %v957_v13  ;;  %v1049_v53 = vmul.f32 1.442695, %v958_v23 }
 0x22c   :  { %v1043_v45 = vmul.f32 1.442695, %v955_v25  ;;  %v1045_v47 = vmul.f32 1.442695, %v956_v18  ;;  %v882_v32 = vpop.xlane.xlu1 %881  ;;  %v2896_v33 = vpop.eup %1601  ;;  %1621 = vpow2.f32 %v1039_v17 }
 0x22d   :  { %v879_v57 = vpop.xlane.xlu0 %878  ;;  %v961_v37 = vsub.f32 %v2640_v1, %v882_v32  ;;  %v2900_v11 = vpop.eup %1603  ;;  %1623 = vpow2.f32 %v1041_v41  ;;  %1133 = vadd.xlane.f32.xlu1 %v1132_v4  ;;  %1136 = vadd.xlane.f32.xlu0 %v1135_v22  ;;  %v962_v58 = vsub.f32 %v2644_v44, %v882_v32 }
 0x22e   :  { %v959_v20 = vsub.f32 %v2648_v3, %v879_v57  ;;  %v960_v59 = vsub.f32 %v2652_v16, %v879_v57  ;;  %v2904_v9 = vpop.eup %1605  ;;  %1625 = vpow2.f32 %v1043_v45  ;;  %v1138_v3 = vadd.f32 %v2890_v48, %v2888_v61 }
 0x22f   :  { %v2906_v7 = vpop.eup %1607  ;;  %1627 = vpow2.f32 %v1045_v47  ;;  %v1141_v17 = vadd.f32 %v2900_v11, %v2896_v33  ;;  %v1055_v44 = vmul.f32 1.442695, %v961_v37  ;;  %v1057_v45 = vmul.f32 1.442695, %v962_v58 }
 0x230   :  { %v1051_v36 = vmul.f32 1.442695, %v959_v20  ;;  %v1053_v1 = vmul.f32 1.442695, %v960_v59  ;;  %v888_v13 = vpop.xlane.xlu1 %887  ;;  %v2912_v41 = vpop.eup %1609  ;;  %1629 = vpow2.f32 %v1047_v38 }
 0x231   :  { %v885_v25 = vpop.xlane.xlu0 %884  ;;  %v965_v16 = vsub.f32 %v2656_v63, %v888_v13  ;;  %v2916_v18 = vpop.eup %1611  ;;  %1631 = vpow2.f32 %v1049_v53  ;;  %1139 = vadd.xlane.f32.xlu1 %v1138_v3  ;;  %1142 = vadd.xlane.f32.xlu0 %v1141_v17  ;;  %v966_v47 = vsub.f32 %v2660_v56, %v888_v13 }
 0x232   :  { %v963_v23 = vsub.f32 %v2666_v15, %v885_v25  ;;  %v964_v4 = vsub.f32 %v2670_v43, %v885_v25  ;;  %v2920_v22 = vpop.eup %1613  ;;  %1633 = vpow2.f32 %v1051_v36  ;;  %v1144_v15 = vadd.f32 %v2906_v7, %v2904_v9 }
 0x233   :  { %v2922_v57 = vpop.eup %1615  ;;  %1635 = vpow2.f32 %v1053_v1  ;;  %v1147_v38 = vadd.f32 %v2916_v18, %v2912_v41  ;;  %v1063_v56 = vmul.f32 1.442695, %v965_v16  ;;  %v1065_v36 = vmul.f32 1.442695, %v966_v47 }
 0x234   :  { %v1059_v32 = vmul.f32 1.442695, %v963_v23  ;;  %v1061_v63 = vmul.f32 1.442695, %v964_v4  ;;  %v894_v37 = vpop.xlane.xlu1 %893  ;;  %v2928_v53 = vpop.eup %1617  ;;  %1637 = vpow2.f32 %v1055_v44 }
 0x235   :  { %v891_v20 = vpop.xlane.xlu0 %890  ;;  %v969_v43 = vsub.f32 %v2674_v24, %v894_v37  ;;  %v2932_v59 = vpop.eup %1619  ;;  %1639 = vpow2.f32 %v1057_v45  ;;  %1145 = vadd.xlane.f32.xlu1 %v1144_v15  ;;  %1148 = vadd.xlane.f32.xlu0 %v1147_v38  ;;  %v970_v1 = vsub.f32 %v2680_v5, %v894_v37 }
 0x236   :  { %v967_v58 = vsub.f32 %v2684_v49, %v891_v20  ;;  %v968_v3 = vsub.f32 %v2688_v60, %v891_v20  ;;  %v2936_v17 = vpop.eup %1621  ;;  %1641 = vpow2.f32 %v1059_v32  ;;  %v1150_v49 = vadd.f32 %v2922_v57, %v2920_v22 }
 0x237   :  { %v2938_v25 = vpop.eup %1623  ;;  %1643 = vpow2.f32 %v1061_v63  ;;  %v1153_v44 = vadd.f32 %v2932_v59, %v2928_v53  ;;  %v1071_v5 = vmul.f32 1.442695, %v969_v43  ;;  %v1073_v32 = vmul.f32 1.442695, %v970_v1 }
 0x238   :  { %v1067_v13 = vmul.f32 1.442695, %v967_v58  ;;  %v1069_v24 = vmul.f32 1.442695, %v968_v3  ;;  %v900_v16 = vpop.xlane.xlu1 %899  ;;  %v2944_v45 = vpop.eup %1625  ;;  %1645 = vpow2.f32 %v1063_v56 }
 0x239   :  { %v897_v23 = vpop.xlane.xlu0 %896  ;;  %v973_v60 = vsub.f32 %v2692_v31, %v900_v16  ;;  %v2948_v4 = vpop.eup %1627  ;;  %1647 = vpow2.f32 %v1065_v36  ;;  %1151 = vadd.xlane.f32.xlu1 %v1150_v49  ;;  %1154 = vadd.xlane.f32.xlu0 %v1153_v44  ;;  %v974_v63 = vsub.f32 %v2696_v28, %v900_v16 }
 0x23a   :  { %v971_v47 = vsub.f32 %v2700_v30, %v897_v23  ;;  %v972_v15 = vsub.f32 %v2704_v26, %v897_v23  ;;  %v2952_v38 = vpop.eup %1629  ;;  %1649 = vpow2.f32 %v1067_v13  ;;  %v1156_v30 = vadd.f32 %v2938_v25, %v2936_v17 }
 0x23b   :  { %v2954_v20 = vpop.eup %1631  ;;  %1651 = vpow2.f32 %v1069_v24  ;;  %v1159_v56 = vadd.f32 %v2948_v4, %v2944_v45  ;;  %v1079_v28 = vmul.f32 1.442695, %v973_v60  ;;  %v1081_v13 = vmul.f32 1.442695, %v974_v63 }
 0x23c   :  { %v1075_v37 = vmul.f32 1.442695, %v971_v47  ;;  %v1077_v31 = vmul.f32 1.442695, %v972_v15  ;;  %v906_v43 = vpop.xlane.xlu1 %905  ;;  %v2960_v36 = vpop.eup %1633  ;;  %1653 = vpow2.f32 %v1071_v5 }
 0x23d   :  { %v903_v58 = vpop.xlane.xlu0 %902  ;;  %v977_v26 = vsub.f32 %v2710_v46, %v906_v43  ;;  %v2964_v3 = vpop.eup %1635  ;;  %1655 = vpow2.f32 %v1073_v32  ;;  %1157 = vadd.xlane.f32.xlu1 %v1156_v30  ;;  %1160 = vadd.xlane.f32.xlu0 %v1159_v56  ;;  %v978_v24 = vsub.f32 %v2714_v50, %v906_v43 }
 0x23e   :  { %v975_v1 = vsub.f32 %v2718_v35, %v903_v58  ;;  %v976_v49 = vsub.f32 %v2724_v42, %v903_v58  ;;  %v2968_v44 = vpop.eup %1637  ;;  %1657 = vpow2.f32 %v1075_v37  ;;  %v1162_v35 = vadd.f32 %v2954_v20, %v2952_v38 }
 0x23f   :  { %v2970_v23 = vpop.eup %1639  ;;  %1659 = vpow2.f32 %v1077_v31  ;;  %v1165_v5 = vadd.f32 %v2964_v3, %v2960_v36  ;;  %v1087_v50 = vmul.f32 1.442695, %v977_v26  ;;  %v1089_v37 = vmul.f32 1.442695, %v978_v24 }
 0x240   :  { %v1083_v16 = vmul.f32 1.442695, %v975_v1  ;;  %v1085_v46 = vmul.f32 1.442695, %v976_v49  ;;  %v912_v60 = vpop.xlane.xlu1 %911  ;;  %v2976_v32 = vpop.eup %1641  ;;  %1661 = vpow2.f32 %v1079_v28 }
 0x241   :  { %v909_v47 = vpop.xlane.xlu0 %908  ;;  %v981_v42 = vsub.f32 %v2728_v21, %v912_v60  ;;  %v2980_v15 = vpop.eup %1643  ;;  %1663 = vpow2.f32 %v1081_v13  ;;  %1163 = vadd.xlane.f32.xlu1 %v1162_v35  ;;  %1166 = vadd.xlane.f32.xlu0 %v1165_v5  ;;  %v982_v31 = vsub.f32 %v2732_v2, %v912_v60 }
 0x242   :  { %v979_v63 = vsub.f32 %v2736_v10, %v909_v47  ;;  %v980_v30 = vsub.f32 %v2740_v19, %v909_v47  ;;  %v2984_v56 = vpop.eup %1645  ;;  %1665 = vpow2.f32 %v1083_v16  ;;  %v1168_v10 = vadd.f32 %v2970_v23, %v2968_v44 }
 0x243   :  { %v2986_v58 = vpop.eup %1647  ;;  %1667 = vpow2.f32 %v1085_v46  ;;  %v1171_v28 = vadd.f32 %v2980_v15, %v2976_v32  ;;  %v1095_v19 = vmul.f32 1.442695, %v981_v42  ;;  %v1097_v16 = vmul.f32 1.442695, %v982_v31  ;;  %v3370_v31 = vld [vmem:[#allocation14_spill] sm:$0xff] }
 0x244   :  { %v1091_v43 = vmul.f32 1.442695, %v979_v63  ;;  %v1093_v21 = vmul.f32 1.442695, %v980_v30  ;;  %v918_v26 = vpop.xlane.xlu1 %917  ;;  %v2992_v13 = vpop.eup %1649  ;;  %1669 = vpow2.f32 %v1087_v50 }
 0x245   :  { %v915_v1 = vpop.xlane.xlu0 %914  ;;  %v985_v2 = vsub.f32 %v2744_v62, %v918_v26  ;;  %v2996_v49 = vpop.eup %1651  ;;  %1671 = vpow2.f32 %v1089_v37  ;;  %1169 = vadd.xlane.f32.xlu1 %v1168_v10  ;;  %1172 = vadd.xlane.f32.xlu0 %v1171_v28  ;;  %v986_v46 = vsub.f32 %v2748_v0, %v918_v26  ;;  %v3372_v10 = vld [vmem:[#allocation31_spill] sm:$0xff]  ;;  %v3373_v26 = vld [vmem:[#allocation16_spill] sm:$0xff] }
 0x246   :  { %v983_v24 = vsub.f32 %v2754_v6, %v915_v1  ;;  %v984_v35 = vsub.f32 %v2758_v55, %v915_v1  ;;  %v3000_v5 = vpop.eup %1653  ;;  %1673 = vpow2.f32 %v1091_v43  ;;  %v1174_v6 = vadd.f32 %v2986_v58, %v2984_v56 }
 0x247   :  { %3367 = vst [vmem:[#allocation26_spill] sm:$0xff] %v3000_v5  ;;  %v3002_v47 = vpop.eup %1655  ;;  %1675 = vpow2.f32 %v1093_v21  ;;  %v1177_v50 = vadd.f32 %v2996_v49, %v2992_v13  ;;  %v1103_v0 = vmul.f32 1.442695, %v985_v2  ;;  %v1105_v21 = vmul.f32 1.442695, %v986_v46 }
 0x248   :  { %v1099_v60 = vmul.f32 1.442695, %v983_v24  ;;  %3368 = vst [vmem:[#allocation28_spill] sm:$0xff] %v3002_v47  ;;  %v1101_v62 = vmul.f32 1.442695, %v984_v35  ;;  %v924_v42 = vpop.xlane.xlu1 %923  ;;  %v3008_v37 = vpop.eup %1657  ;;  %1677 = vpow2.f32 %v1095_v19  ;;  %v1180_v2 = vadd.f32 %v3002_v47, %v3000_v5 }
 0x249   :  { %v921_v63 = vpop.xlane.xlu0 %920  ;;  %3369 = vst [vmem:[#allocation30_spill] sm:$0xff] %v3008_v37  ;;  %v989_v55 = vsub.f32 %v2762_v54, %v924_v42  ;;  %v3012_v43 = vpop.eup %1659  ;;  %1679 = vpow2.f32 %v1097_v16  ;;  %1175 = vadd.xlane.f32.xlu1 %v1174_v6  ;;  %1178 = vadd.xlane.f32.xlu0 %v1177_v50  ;;  %v990_v28 = vsub.f32 %v3372_v10, %v924_v42 }
 0x24a   :  { %v987_v30 = vsub.f32 %v3370_v31, %v921_v63  ;;  %3371 = vst [vmem:[#allocation5_spill] sm:$0xff] %v3012_v43  ;;  %v988_v1 = vsub.f32 %v3373_v26, %v921_v63  ;;  %v3016_v24 = vpop.eup %1661  ;;  %1681 = vpow2.f32 %v1099_v60  ;;  %v1183_v16 = vadd.f32 %v3012_v43, %v3008_v37  ;;  %v3376_v63 = vld [vmem:[#allocation22_spill] sm:$0xff]  ;;  %v3379_v26 = vld [vmem:[#allocation24_spill] sm:$0xff] }
 0x24b   :  { %v3018_v19 = vpop.eup %1663  ;;  %1683 = vpow2.f32 %v1101_v62  ;;  %v1111_v42 = vmul.f32 1.442695, %v989_v55  ;;  %v3378_v62 = vld [vmem:[#allocation18_spill] sm:$0xff]  ;;  %v3381_v43 = vld [vmem:[#allocation20_spill] sm:$0xff] }
 0x24c   :  { %v1107_v35 = vmul.f32 1.442695, %v987_v30  ;;  %3374 = vst [vmem:[#allocation6_spill] sm:$0xff] %v3018_v19  ;;  %v1109_v54 = vmul.f32 1.442695, %v988_v1  ;;  %v930_v46 = vpop.xlane.xlu1 %929  ;;  %v3024_v50 = vpop.eup %1665  ;;  %1685 = vpow2.f32 %v1103_v0 }
 0x24d   :  { %v927_v6 = vpop.xlane.xlu0 %926  ;;  %3375 = vst [vmem:[#allocation7_spill] sm:$0xff] %v3024_v50  ;;  %v3027_v60 = vpop.eup %1667  ;;  %1687 = vpow2.f32 %v1105_v21  ;;  %v1113_v30 = vmul.f32 1.442695, %v990_v28  ;;  %1181 = vadd.xlane.f32.xlu1 %v1180_v2  ;;  %1184 = vadd.xlane.f32.xlu0 %v1183_v16  ;;  %v993_v10 = vsub.f32 %v3378_v62, %v930_v46  ;;  %v994_v37 = vsub.f32 %v3381_v43, %v930_v46 }
 0x24e   :  { %v991_v31 = vsub.f32 %v3376_v63, %v927_v6  ;;  %3377 = vst [vmem:[#allocation10_spill] sm:$0xff] %v3027_v60  ;;  %v992_v1 = vsub.f32 %v3379_v26, %v927_v6  ;;  %v3031_v47 = vpop.eup %1669  ;;  %1689 = vpow2.f32 %v1107_v35  ;;  %v1186_v21 = vadd.f32 %v3018_v19, %v3016_v24 }
 0x24f   :  { %3380 = vst [vmem:[#allocation11_spill] sm:$0xff] %v3031_v47  ;;  %v3034_v0 = vpop.eup %1671  ;;  %1691 = vpow2.f32 %v1109_v54  ;;  %v1189_v28 = vadd.f32 %v3027_v60, %v3024_v50  ;;  %v1119_v35 = vmul.f32 1.442695, %v993_v10  ;;  %v1121_v46 = vmul.f32 1.442695, %v994_v37 }
 0x250   :  { %v1115_v5 = vmul.f32 1.442695, %v991_v31  ;;  %3382 = vst [vmem:[#allocation8_spill] sm:$0xff] %v3034_v0  ;;  %v1117_v55 = vmul.f32 1.442695, %v992_v1  ;;  %v3040_v2 = vpop.eup %1673  ;;  %1693 = vpow2.f32 %v1111_v42  ;;  %v1192_v63 = vadd.f32 %v3034_v0, %v3031_v47 }
 0x251   :  { %3383 = vst [vmem:[#allocation9_spill] sm:$0xff] %v3040_v2  ;;  %v3042_v16 = vpop.eup %1675  ;;  %1695 = vpow2.f32 %v1113_v30  ;;  %1187 = vadd.xlane.f32.xlu1 %v1186_v21  ;;  %1190 = vadd.xlane.f32.xlu0 %v1189_v28 }
 0x252   :  { %3384 = vst [vmem:[#allocation12_spill] sm:$0xff] %v3042_v16  ;;  %v3044_v43 = vpop.eup %1677  ;;  %1697 = vpow2.f32 %v1115_v5  ;;  %v1195_v54 = vadd.f32 %v3042_v16, %v3040_v2 }
 0x253   :  { %3385 = vst [vmem:[#allocation32_spill] sm:$0xff] %v3044_v43  ;;  %v3048_v6 = vpop.eup %1679  ;;  %1699 = vpow2.f32 %v1117_v55 }
 0x254   :  { %3386 = vst [vmem:[#allocation13_spill] sm:$0xff] %v3048_v6  ;;  %v3052_v42 = vpop.eup %1681  ;;  %1701 = vpow2.f32 %v1119_v35  ;;  %v1198_v62 = vadd.f32 %v3048_v6, %v3044_v43 }
 0x255   :  { %3387 = vst [vmem:[#allocation15_spill] sm:$0xff] %v3052_v42  ;;  %v3054_v31 = vpop.eup %1683  ;;  %1193 = vadd.xlane.f32.xlu1 %v1192_v63  ;;  %1196 = vadd.xlane.f32.xlu0 %v1195_v54  ;;  %1703 = vpow2.f32 %v1121_v46 }
 0x256   :  { %3388 = vst [vmem:[#allocation17_spill] sm:$0xff] %v3054_v31  ;;  %v3056_v30 = vpop.eup %1685  ;;  %v1201_v5 = vadd.f32 %v3054_v31, %v3052_v42 }
 0x257   :  { %3389 = vst [vmem:[#allocation19_spill] sm:$0xff] %v3056_v30  ;;  %v3060_v37 = vpop.eup %1687 }
 0x258   :  { %3390 = vst [vmem:[#allocation23_spill] sm:$0xff] %v3060_v37  ;;  %v3064_v10 = vpop.eup %1689  ;;  %v1204_v28 = vadd.f32 %v3060_v37, %v3056_v30 }
 0x259   :  { %3391 = vst [vmem:[#allocation21_spill] sm:$0xff] %v3064_v10  ;;  %v3066_v26 = vpop.eup %1691  ;;  %1199 = vadd.xlane.f32.xlu1 %v1198_v62  ;;  %1202 = vadd.xlane.f32.xlu0 %v1201_v5 }
 0x25a   :  { %3392 = vst [vmem:[#allocation25_spill] sm:$0xff] %v3066_v26  ;;  %v3068_v1 = vpop.eup %1693  ;;  %v1207_v55 = vadd.f32 %v3066_v26, %v3064_v10 }
 0x25b   :  { %3393 = vst [vmem:[#allocation27_spill] sm:$0xff] %v3068_v1  ;;  %v3072_v21 = vpop.eup %1695 }
 0x25c   :  { %3394 = vst [vmem:[#allocation29_spill] sm:$0xff] %v3072_v21  ;;  %v3076_v35 = vpop.eup %1697  ;;  %v1210_v5 = vadd.f32 %v3072_v21, %v3068_v1 }
 0x25d   :  { %3395 = vst [vmem:[#allocation14_spill] sm:$0xff] %v3076_v35  ;;  %v3078_v46 = vpop.eup %1699  ;;  %1205 = vadd.xlane.f32.xlu1 %v1204_v28  ;;  %1208 = vadd.xlane.f32.xlu0 %v1207_v55 }
 0x25e   :  { %3396 = vst [vmem:[#allocation31_spill] sm:$0xff] %v3078_v46  ;;  %v1213_v54 = vadd.f32 %v3078_v46, %v3076_v35  ;;  %v3082_v63 = vpop.eup %1701 }
 0x25f   :  { %3397 = vst [vmem:[#allocation16_spill] sm:$0xff] %v3082_v63  ;;  %v3086_v62 = vpop.eup %1703 }
 0x260   :  { %3398 = vst [vmem:[#allocation22_spill] sm:$0xff] %v3086_v62  ;;  %v1216_v26 = vadd.f32 %v3086_v62, %v3082_v63 }
 0x261   :  { %1211 = vadd.xlane.f32.xlu1 %v1210_v5  ;;  %1214 = vadd.xlane.f32.xlu0 %v1213_v54 }
 0x265   :  { %1217 = vadd.xlane.f32.xlu1 %v1216_v26 }
 0x2b1   :  { %v1125_v10 = vpop.xlane.xlu0 %1124 }
 0x2b2   :  { %1705 = vrcp.f32 %v1125_v10 }
 0x2b5   :  { %v1131_v55 = vpop.xlane.xlu0 %1130 }
 0x2b6   :  { %v1128_v28 = vpop.xlane.xlu1 %1127 }
 0x2b7   :  { %1707 = vrcp.f32 %v1128_v28 }
 0x2b8   :  { %1709 = vrcp.f32 %v1131_v55 }
 0x2ba   :  { %v1134_v46 = vpop.xlane.xlu1 %1133  ;;  %v1137_v35 = vpop.xlane.xlu0 %1136 }
 0x2bb   :  { %1711 = vrcp.f32 %v1134_v46 }
 0x2bc   :  { %1713 = vrcp.f32 %v1137_v35  ;;  %v1706_v37 = vpop.eup %1705 }
 0x2bd   :  { %v1251_v21 = vmul.f32 %v1706_v37, %v1125_v10 }
 0x2be   :  { %v1140_v1 = vpop.xlane.xlu1 %1139  ;;  %v1143_v30 = vpop.xlane.xlu0 %1142 }
 0x2bf   :  { %1715 = vrcp.f32 %v1140_v1  ;;  %v1283_v54 = vsub.f32 2.0, %v1251_v21 }
 0x2c0   :  { %1717 = vrcp.f32 %v1143_v30 }
 0x2c1   :  { %v1708_v5 = vpop.eup %1707  ;;  %v1315_v26 = vmul.f32 %v1706_v37, %v1283_v54 }
 0x2c2   :  { %v1710_v62 = vpop.eup %1709  ;;  %v1252_v63 = vmul.f32 %v1708_v5, %v1128_v28  ;;  %v1146_v31 = vpop.xlane.xlu1 %1145 }
 0x2c3   :  { %v1149_v42 = vpop.xlane.xlu0 %1148  ;;  %v1253_v6 = vmul.f32 %v1710_v62, %v1131_v55  ;;  %1719 = vrcp.f32 %v1146_v31  ;;  %v1347_v43 = vmul.f32 %v2850_v39, %v1315_v26  ;;  %v1348_v16 = vmul.f32 %v2854_v52, %v1315_v26 }
 0x2c4   :  { %v1284_v2 = vsub.f32 2.0, %v1252_v63  ;;  %1721 = vrcp.f32 %v1149_v42 }
 0x2c5   :  { %v1712_v10 = vpop.eup %1711  ;;  %v1285_v0 = vsub.f32 2.0, %v1253_v6  ;;  %1411 = vst [vmem:[#allocation2] sm:$0xff] %v1347_v43  ;;  %1412 = vst [vmem:[#allocation2 + $0x8] sm:$0xff] %v1348_v16 }
 0x2c6   :  { %v1714_v47 = vpop.eup %1713  ;;  %v1316_v21 = vmul.f32 %v1708_v5, %v1284_v2  ;;  %v1254_v60 = vmul.f32 %v1712_v10, %v1134_v46  ;;  %v1152_v50 = vpop.xlane.xlu1 %1151 }
 0x2c7   :  { %v1155_v37 = vpop.xlane.xlu0 %1154  ;;  %v1317_v28 = vmul.f32 %v1710_v62, %v1285_v0  ;;  %v1255_v54 = vmul.f32 %v1714_v47, %v1137_v35  ;;  %1723 = vrcp.f32 %v1152_v50 }
 0x2c8   :  { %v1349_v55 = vmul.f32 %v2864_v27, %v1316_v21  ;;  %v1350_v39 = vmul.f32 %v2868_v29, %v1316_v21  ;;  %v1286_v19 = vsub.f32 2.0, %v1254_v60  ;;  %1725 = vrcp.f32 %v1155_v37 }
 0x2c9   :  { %v1716_v52 = vpop.eup %1715  ;;  %v1351_v63 = vmul.f32 %v2858_v8, %v1317_v28  ;;  %v1352_v6 = vmul.f32 %v2860_v40, %v1317_v28  ;;  %v1287_v43 = vsub.f32 2.0, %v1255_v54 }
 0x2ca   :  { %v1718_v16 = vpop.eup %1717  ;;  %1413 = vst [vmem:[#allocation2 + $0x10] sm:$0xff] %v1349_v55  ;;  %1414 = vst [vmem:[#allocation2 + $0x18] sm:$0xff] %v1350_v39  ;;  %v1318_v2 = vmul.f32 %v1712_v10, %v1286_v19  ;;  %v1256_v46 = vmul.f32 %v1716_v52, %v1140_v1  ;;  %v1158_v0 = vpop.xlane.xlu1 %1157 }
 0x2cb   :  { %v3096_v35 = vpop.xlane.xlu0 %1160  ;;  %1415 = vst [vmem:[#allocation2 + $0x20] sm:$0xff] %v1351_v63  ;;  %1416 = vst [vmem:[#allocation2 + $0x28] sm:$0xff] %v1352_v6  ;;  %v1319_v27 = vmul.f32 %v1714_v47, %v1287_v43  ;;  %v1257_v29 = vmul.f32 %v1718_v16, %v1143_v30  ;;  %1727 = vrcp.f32 %v1158_v0 }
 0x2cc   :  { %v1353_v60 = vmul.f32 %v2872_v51, %v1318_v2  ;;  %v1354_v8 = vmul.f32 %v2874_v34, %v1318_v2  ;;  %v1288_v62 = vsub.f32 2.0, %v1256_v46  ;;  %1729 = vrcp.f32 %v3096_v35 }
 0x2cd   :  { %v1720_v40 = vpop.eup %1719  ;;  %v1355_v5 = vmul.f32 %v2880_v12, %v1319_v27  ;;  %v1356_v19 = vmul.f32 %v2884_v14, %v1319_v27  ;;  %v1289_v1 = vsub.f32 2.0, %v1257_v29 }
 0x2ce   :  { %v1722_v26 = vpop.eup %1721  ;;  %1417 = vst [vmem:[#allocation2 + $0x30] sm:$0xff] %v1353_v60  ;;  %1418 = vst [vmem:[#allocation2 + $0x38] sm:$0xff] %v1354_v8  ;;  %v1320_v10 = vmul.f32 %v1716_v52, %v1288_v62  ;;  %v1258_v47 = vmul.f32 %v1720_v40, %v1146_v31  ;;  %v1164_v30 = vpop.xlane.xlu1 %1163 }
 0x2cf   :  { %v3103_v21 = vpop.xlane.xlu0 %1166  ;;  %1419 = vst [vmem:[#allocation2 + $0x40] sm:$0xff] %v1355_v5  ;;  %1420 = vst [vmem:[#allocation2 + $0x48] sm:$0xff] %v1356_v19  ;;  %v1321_v51 = vmul.f32 %v1718_v16, %v1289_v1  ;;  %v1259_v34 = vmul.f32 %v1722_v26, %v1149_v42  ;;  %1731 = vrcp.f32 %v1164_v30 }
 0x2d0   :  { %v1357_v28 = vmul.f32 %v2888_v61, %v1320_v10  ;;  %v1358_v12 = vmul.f32 %v2890_v48, %v1320_v10  ;;  %v1290_v54 = vsub.f32 2.0, %v1258_v47  ;;  %1733 = vrcp.f32 %v3103_v21 }
 0x2d1   :  { %v1724_v14 = vpop.eup %1723  ;;  %v1359_v55 = vmul.f32 %v2896_v33, %v1321_v51  ;;  %v1360_v31 = vmul.f32 %v2900_v11, %v1321_v51  ;;  %v1291_v39 = vsub.f32 2.0, %v1259_v34 }
 0x2d2   :  { %v1726_v52 = vpop.eup %1725  ;;  %1421 = vst [vmem:[#allocation2 + $0x50] sm:$0xff] %v1357_v28  ;;  %1422 = vst [vmem:[#allocation2 + $0x58] sm:$0xff] %v1358_v12  ;;  %v1322_v63 = vmul.f32 %v1720_v40, %v1290_v54  ;;  %v1260_v6 = vmul.f32 %v1724_v14, %v1152_v50  ;;  %v1170_v42 = vpop.xlane.xlu1 %1169 }
 0x2d3   :  { %v3110_v43 = vpop.xlane.xlu0 %1172  ;;  %1423 = vst [vmem:[#allocation2 + $0x60] sm:$0xff] %v1359_v55  ;;  %1424 = vst [vmem:[#allocation2 + $0x68] sm:$0xff] %v1360_v31  ;;  %v1323_v61 = vmul.f32 %v1722_v26, %v1291_v39  ;;  %v1261_v48 = vmul.f32 %v1726_v52, %v1155_v37  ;;  %1735 = vrcp.f32 %v1170_v42 }
 0x2d4   :  { %v1361_v16 = vmul.f32 %v2904_v9, %v1322_v63  ;;  %v1362_v33 = vmul.f32 %v2906_v7, %v1322_v63  ;;  %v1292_v2 = vsub.f32 2.0, %v1260_v6  ;;  %1737 = vrcp.f32 %v3110_v43 }
 0x2d5   :  { %v1728_v11 = vpop.eup %1727  ;;  %v1363_v46 = vmul.f32 %v2912_v41, %v1323_v61  ;;  %v1364_v50 = vmul.f32 %v2916_v18, %v1323_v61  ;;  %v1293_v27 = vsub.f32 2.0, %v1261_v48 }
 0x2d6   :  { %v1730_v29 = vpop.eup %1729  ;;  %1425 = vst [vmem:[#allocation2 + $0x70] sm:$0xff] %v1361_v16  ;;  %1426 = vst [vmem:[#allocation2 + $0x78] sm:$0xff] %v1362_v33  ;;  %v1324_v60 = vmul.f32 %v1724_v14, %v1292_v2  ;;  %v1262_v8 = vmul.f32 %v1728_v11, %v1158_v0  ;;  %v1176_v37 = vpop.xlane.xlu1 %1175 }
 0x2d7   :  { %v3117_v62 = vpop.xlane.xlu0 %1178  ;;  %1427 = vst [vmem:[#allocation2 + $0x80] sm:$0xff] %v1363_v46  ;;  %1428 = vst [vmem:[#allocation2 + $0x88] sm:$0xff] %v1364_v50  ;;  %v1325_v9 = vmul.f32 %v1726_v52, %v1293_v27  ;;  %v1263_v7 = vmul.f32 %v1730_v29, %v3096_v35  ;;  %1739 = vrcp.f32 %v1176_v37 }
 0x2d8   :  { %v1365_v40 = vmul.f32 %v2920_v22, %v1324_v60  ;;  %v1366_v41 = vmul.f32 %v2922_v57, %v1324_v60  ;;  %v1294_v18 = vsub.f32 2.0, %v1262_v8  ;;  %1741 = vrcp.f32 %v3117_v62 }
 0x2d9   :  { %v1732_v5 = vpop.eup %1731  ;;  %v1367_v19 = vmul.f32 %v2928_v53, %v1325_v9  ;;  %v1368_v0 = vmul.f32 %v2932_v59, %v1325_v9  ;;  %v1295_v1 = vsub.f32 2.0, %v1263_v7 }
 0x2da   :  { %v1734_v26 = vpop.eup %1733  ;;  %1429 = vst [vmem:[#allocation2 + $0x90] sm:$0xff] %v1365_v40  ;;  %1430 = vst [vmem:[#allocation2 + $0x98] sm:$0xff] %v1366_v41  ;;  %v1326_v10 = vmul.f32 %v1728_v11, %v1294_v18  ;;  %v1264_v47 = vmul.f32 %v1732_v5, %v1164_v30  ;;  %v1182_v35 = vpop.xlane.xlu1 %1181 }
 0x2db   :  { %v3125_v51 = vpop.xlane.xlu0 %1184  ;;  %1431 = vst [vmem:[#allocation2 + $0xa0] sm:$0xff] %v1367_v19  ;;  %1432 = vst [vmem:[#allocation2 + $0xa8] sm:$0xff] %v1368_v0  ;;  %v1327_v22 = vmul.f32 %v1730_v29, %v1295_v1  ;;  %v1265_v57 = vmul.f32 %v1734_v26, %v3103_v21  ;;  %1743 = vrcp.f32 %v1182_v35 }
 0x2dc   :  { %v1369_v34 = vmul.f32 %v2936_v17, %v1326_v10  ;;  %v1370_v53 = vmul.f32 %v2938_v25, %v1326_v10  ;;  %v1296_v59 = vsub.f32 2.0, %v1264_v47  ;;  %1745 = vrcp.f32 %v3125_v51  ;;  %v3399_v47 = vld [vmem:[#allocation26_spill] sm:$0xff] }
 0x2dd   :  { %v1736_v28 = vpop.eup %1735  ;;  %v1371_v12 = vmul.f32 %v2944_v45, %v1327_v22  ;;  %v1372_v30 = vmul.f32 %v2948_v4, %v1327_v22  ;;  %v1297_v54 = vsub.f32 2.0, %v1265_v57  ;;  %v3401_v57 = vld [vmem:[#allocation30_spill] sm:$0xff] }
 0x2de   :  { %v1738_v14 = vpop.eup %1737  ;;  %1433 = vst [vmem:[#allocation2 + $0xb0] sm:$0xff] %v1369_v34  ;;  %1434 = vst [vmem:[#allocation2 + $0xb8] sm:$0xff] %v1370_v53  ;;  %v1328_v55 = vmul.f32 %v1732_v5, %v1296_v59  ;;  %v1266_v31 = vmul.f32 %v1736_v28, %v1170_v42  ;;  %v1188_v21 = vpop.xlane.xlu1 %1187  ;;  %v3402_v53 = vld [vmem:[#allocation5_spill] sm:$0xff] }
 0x2df   :  { %v3133_v39 = vpop.xlane.xlu0 %1190  ;;  %1435 = vst [vmem:[#allocation2 + $0xc0] sm:$0xff] %v1371_v12  ;;  %1436 = vst [vmem:[#allocation2 + $0xc8] sm:$0xff] %v1372_v30  ;;  %v1329_v17 = vmul.f32 %v1734_v26, %v1297_v54  ;;  %v1267_v25 = vmul.f32 %v1738_v14, %v3110_v43  ;;  %1747 = vrcp.f32 %v1188_v21 }
 0x2e0   :  { %v1373_v52 = vmul.f32 %v2952_v38, %v1328_v55  ;;  %v1374_v45 = vmul.f32 %v2954_v20, %v1328_v55  ;;  %v1298_v4 = vsub.f32 2.0, %v1266_v31  ;;  %1749 = vrcp.f32 %v3133_v39 }
 0x2e1   :  { %v1740_v63 = vpop.eup %1739  ;;  %v1375_v6 = vmul.f32 %v2960_v36, %v1329_v17  ;;  %v1376_v42 = vmul.f32 %v2964_v3, %v1329_v17  ;;  %v1299_v61 = vsub.f32 2.0, %v1267_v25  ;;  %v3403_v17 = vld [vmem:[#allocation6_spill] sm:$0xff] }
 0x2e2   :  { %v1742_v48 = vpop.eup %1741  ;;  %1437 = vst [vmem:[#allocation2 + $0xd0] sm:$0xff] %v1373_v52  ;;  %1438 = vst [vmem:[#allocation2 + $0xd8] sm:$0xff] %v1374_v45  ;;  %v1330_v16 = vmul.f32 %v1736_v28, %v1298_v4  ;;  %v1268_v33 = vmul.f32 %v1740_v63, %v1176_v37  ;;  %v1194_v43 = vpop.xlane.xlu1 %1193  ;;  %v3404_v4 = vld [vmem:[#allocation7_spill] sm:$0xff] }
 0x2e3   :  { %v3141_v2 = vpop.xlane.xlu0 %1196  ;;  %1439 = vst [vmem:[#allocation2 + $0xe0] sm:$0xff] %v1375_v6  ;;  %1440 = vst [vmem:[#allocation2 + $0xe8] sm:$0xff] %v1376_v42  ;;  %v1331_v38 = vmul.f32 %v1738_v14, %v1299_v61  ;;  %v1269_v20 = vmul.f32 %v1742_v48, %v3117_v62  ;;  %1751 = vrcp.f32 %v1194_v43  ;;  %v3405_v6 = vld [vmem:[#allocation10_spill] sm:$0xff] }
 0x2e4   :  { %v1377_v11 = vmul.f32 %v2968_v44, %v1330_v16  ;;  %v1378_v36 = vmul.f32 %v2970_v23, %v1330_v16  ;;  %v1300_v3 = vsub.f32 2.0, %v1268_v33  ;;  %1753 = vrcp.f32 %v3141_v2 }
 0x2e5   :  { %v1744_v46 = vpop.eup %1743  ;;  %v1379_v50 = vmul.f32 %v2976_v32, %v1331_v38  ;;  %v1380_v27 = vmul.f32 %v2980_v15, %v1331_v38  ;;  %v1301_v29 = vsub.f32 2.0, %v1269_v20  ;;  %v3406_v38 = vld [vmem:[#allocation11_spill] sm:$0xff] }
 0x2e6   :  { %v1746_v60 = vpop.eup %1745  ;;  %1441 = vst [vmem:[#allocation2 + $0xf0] sm:$0xff] %v1377_v11  ;;  %1442 = vst [vmem:[#allocation2 + $0xf8] sm:$0xff] %v1378_v36  ;;  %v1332_v8 = vmul.f32 %v1740_v63, %v1300_v3  ;;  %v1270_v37 = vmul.f32 %v1744_v46, %v1182_v35  ;;  %v1200_v62 = vpop.xlane.xlu1 %1199  ;;  %v3407_v11 = vld [vmem:[#allocation8_spill] sm:$0xff] }
 0x2e7   :  { %v3149_v9 = vpop.xlane.xlu0 %1202  ;;  %1443 = vst [vmem:[#allocation2 + $0x100] sm:$0xff] %v1379_v50  ;;  %1444 = vst [vmem:[#allocation2 + $0x108] sm:$0xff] %v1380_v27  ;;  %v1333_v44 = vmul.f32 %v1742_v48, %v1301_v29  ;;  %v1271_v23 = vmul.f32 %v1746_v60, %v3125_v51  ;;  %1755 = vrcp.f32 %v1200_v62  ;;  %v3400_v51 = vld [vmem:[#allocation28_spill] sm:$0xff]  ;;  %v3408_v50 = vld [vmem:[#allocation9_spill] sm:$0xff] }
 0x2e8   :  { %v1381_v7 = vmul.f32 %v2984_v56, %v1332_v8  ;;  %v1382_v32 = vmul.f32 %v2986_v58, %v1332_v8  ;;  %v1302_v15 = vsub.f32 2.0, %v1270_v37  ;;  %1757 = vrcp.f32 %v3149_v9  ;;  %v3409_v29 = vld [vmem:[#allocation12_spill] sm:$0xff] }
 0x2e9   :  { %v1748_v40 = vpop.eup %1747  ;;  %v1383_v41 = vmul.f32 %v2992_v13, %v1333_v44  ;;  %v1384_v18 = vmul.f32 %v2996_v49, %v1333_v44  ;;  %v1303_v5 = vsub.f32 2.0, %v1271_v23 }
 0x2ea   :  { %v1750_v19 = vpop.eup %1749  ;;  %1445 = vst [vmem:[#allocation2 + $0x110] sm:$0xff] %v1381_v7  ;;  %1446 = vst [vmem:[#allocation2 + $0x118] sm:$0xff] %v1382_v32  ;;  %v1334_v0 = vmul.f32 %v1744_v46, %v1302_v15  ;;  %v1272_v1 = vmul.f32 %v1748_v40, %v1188_v21  ;;  %v1206_v26 = vpop.xlane.xlu1 %1205  ;;  %v3410_v7 = vld [vmem:[#allocation32_spill] sm:$0xff]  ;;  %v3411_v15 = vld [vmem:[#allocation13_spill] sm:$0xff] }
 0x2eb   :  { %v1209_v10 = vpop.xlane.xlu0 %1208  ;;  %1447 = vst [vmem:[#allocation2 + $0x120] sm:$0xff] %v1383_v41  ;;  %1448 = vst [vmem:[#allocation2 + $0x128] sm:$0xff] %v1384_v18  ;;  %v1335_v56 = vmul.f32 %v1746_v60, %v1303_v5  ;;  %v1273_v58 = vmul.f32 %v1750_v19, %v3133_v39  ;;  %1759 = vrcp.f32 %v1206_v26  ;;  %v3412_v5 = vld [vmem:[#allocation15_spill] sm:$0xff] }
 0x2ec   :  { %v1385_v35 = vmul.f32 %v3399_v47, %v1334_v0  ;;  %v1386_v13 = vmul.f32 %v3400_v51, %v1334_v0  ;;  %v1304_v22 = vsub.f32 2.0, %v1272_v1  ;;  %1761 = vrcp.f32 %v1209_v10  ;;  %v3413_v0 = vld [vmem:[#allocation17_spill] sm:$0xff]  ;;  %v3414_v51 = vld [vmem:[#allocation19_spill] sm:$0xff] }
 0x2ed   :  { %v1752_v49 = vpop.eup %1751  ;;  %v1387_v34 = vmul.f32 %v3401_v57, %v1335_v56  ;;  %v1388_v59 = vmul.f32 %v3402_v53, %v1335_v56  ;;  %v1305_v28 = vsub.f32 2.0, %v1273_v58  ;;  %v3416_v53 = vld [vmem:[#allocation21_spill] sm:$0xff] }
 0x2ee   :  { %v1754_v12 = vpop.eup %1753  ;;  %1449 = vst [vmem:[#allocation2 + $0x130] sm:$0xff] %v1385_v35  ;;  %1450 = vst [vmem:[#allocation2 + $0x138] sm:$0xff] %v1386_v13  ;;  %v1336_v30 = vmul.f32 %v1748_v40, %v1304_v22  ;;  %v1274_v54 = vmul.f32 %v1752_v49, %v1194_v43  ;;  %v1212_v14 = vpop.xlane.xlu1 %1211  ;;  %v3415_v22 = vld [vmem:[#allocation23_spill] sm:$0xff] }
 0x2ef   :  { %v1215_v55 = vpop.xlane.xlu0 %1214  ;;  %1451 = vst [vmem:[#allocation2 + $0x140] sm:$0xff] %v1387_v34  ;;  %1452 = vst [vmem:[#allocation2 + $0x148] sm:$0xff] %v1388_v59  ;;  %v1337_v31 = vmul.f32 %v1750_v19, %v1305_v28  ;;  %v1275_v21 = vmul.f32 %v1754_v12, %v3141_v2  ;;  %1763 = vrcp.f32 %v1212_v14  ;;  %v3417_v28 = vld [vmem:[#allocation25_spill] sm:$0xff] }
 0x2f0   :  { %v1389_v39 = vmul.f32 %v3016_v24, %v1336_v30  ;;  %v1390_v25 = vmul.f32 %v3403_v17, %v1336_v30  ;;  %v1306_v52 = vsub.f32 2.0, %v1274_v54  ;;  %1765 = vrcp.f32 %v1215_v55 }
 0x2f1   :  { %v1756_v45 = vpop.eup %1755  ;;  %v1391_v63 = vmul.f32 %v3404_v4, %v1337_v31  ;;  %v1392_v42 = vmul.f32 %v3405_v6, %v1337_v31  ;;  %v1307_v61 = vsub.f32 2.0, %v1275_v21  ;;  %v3418_v21 = vld [vmem:[#allocation27_spill] sm:$0xff] }
 0x2f2   :  { %v1758_v48 = vpop.eup %1757  ;;  %1453 = vst [vmem:[#allocation2 + $0x150] sm:$0xff] %v1389_v39  ;;  %1454 = vst [vmem:[#allocation2 + $0x158] sm:$0xff] %v1390_v25  ;;  %v1338_v16 = vmul.f32 %v1752_v49, %v1306_v52  ;;  %v1276_v33 = vmul.f32 %v1756_v45, %v1200_v62  ;;  %v1218_v43 = vpop.xlane.xlu1 %1217  ;;  %v3419_v39 = vld [vmem:[#allocation29_spill] sm:$0xff]  ;;  %v3420_v52 = vld [vmem:[#allocation14_spill] sm:$0xff] }
 0x2f3   :  { %1455 = vst [vmem:[#allocation2 + $0x160] sm:$0xff] %v1391_v63  ;;  %1456 = vst [vmem:[#allocation2 + $0x168] sm:$0xff] %v1392_v42  ;;  %v1339_v2 = vmul.f32 %v1754_v12, %v1307_v61  ;;  %v1277_v24 = vmul.f32 %v1758_v48, %v3149_v9  ;;  %1767 = vrcp.f32 %v1218_v43  ;;  %v3421_v4 = vld [vmem:[#allocation31_spill] sm:$0xff]  ;;  %v3422_v42 = vld [vmem:[#allocation16_spill] sm:$0xff] }
 0x2f4   :  { %v1393_v20 = vmul.f32 %v3406_v38, %v1338_v16  ;;  %v1394_v36 = vmul.f32 %v3407_v11, %v1338_v16  ;;  %v1308_v3 = vsub.f32 2.0, %v1276_v33 }
 0x2f5   :  { %v1760_v46 = vpop.eup %1759  ;;  %v1395_v27 = vmul.f32 %v3408_v50, %v1339_v2  ;;  %v1396_v60 = vmul.f32 %v3409_v29, %v1339_v2  ;;  %v1309_v8 = vsub.f32 2.0, %v1277_v24 }
 0x2f6   :  { %v1762_v37 = vpop.eup %1761  ;;  %1457 = vst [vmem:[#allocation2 + $0x170] sm:$0xff] %v1393_v20  ;;  %1458 = vst [vmem:[#allocation2 + $0x178] sm:$0xff] %v1394_v36  ;;  %v1340_v62 = vmul.f32 %v1756_v45, %v1308_v3  ;;  %v1278_v44 = vmul.f32 %v1760_v46, %v1206_v26 }
 0x2f7   :  { %1459 = vst [vmem:[#allocation2 + $0x180] sm:$0xff] %v1395_v27  ;;  %1460 = vst [vmem:[#allocation2 + $0x188] sm:$0xff] %v1396_v60  ;;  %v1341_v9 = vmul.f32 %v1758_v48, %v1309_v8  ;;  %v1279_v23 = vmul.f32 %v1762_v37, %v1209_v10  ;;  %v3423_v48 = vld [vmem:[#allocation22_spill] sm:$0xff] }
 0x2f8   :  { %v1397_v32 = vmul.f32 %v3410_v7, %v1340_v62  ;;  %v1398_v40 = vmul.f32 %v3411_v15, %v1340_v62  ;;  %v1310_v41 = vsub.f32 2.0, %v1278_v44 }
 0x2f9   :  { %v1764_v18 = vpop.eup %1763  ;;  %v1399_v19 = vmul.f32 %v3412_v5, %v1341_v9  ;;  %v1400_v1 = vmul.f32 %v3413_v0, %v1341_v9  ;;  %v1311_v56 = vsub.f32 2.0, %v1279_v23 }
 0x2fa   :  { %v1766_v58 = vpop.eup %1765  ;;  %1461 = vst [vmem:[#allocation2 + $0x190] sm:$0xff] %v1397_v32  ;;  %1462 = vst [vmem:[#allocation2 + $0x198] sm:$0xff] %v1398_v40  ;;  %v1342_v47 = vmul.f32 %v1760_v46, %v1310_v41  ;;  %v1280_v26 = vmul.f32 %v1764_v18, %v1212_v14 }
 0x2fb   :  { %1463 = vst [vmem:[#allocation2 + $0x1a0] sm:$0xff] %v1399_v19  ;;  %1464 = vst [vmem:[#allocation2 + $0x1a8] sm:$0xff] %v1400_v1  ;;  %v1343_v35 = vmul.f32 %v1762_v37, %v1311_v56  ;;  %v1281_v10 = vmul.f32 %v1766_v58, %v1215_v55 }
 0x2fc   :  { %v1401_v13 = vmul.f32 %v3414_v51, %v1342_v47  ;;  %v1402_v49 = vmul.f32 %v3415_v22, %v1342_v47  ;;  %v1312_v57 = vsub.f32 2.0, %v1280_v26 }
 0x2fd   :  { %v1768_v34 = vpop.eup %1767  ;;  %v1403_v59 = vmul.f32 %v3416_v53, %v1343_v35  ;;  %v1404_v12 = vmul.f32 %v3417_v28, %v1343_v35  ;;  %v1313_v30 = vsub.f32 2.0, %v1281_v10 }
 0x2fe   :  { %1465 = vst [vmem:[#allocation2 + $0x1b0] sm:$0xff] %v1401_v13  ;;  %1466 = vst [vmem:[#allocation2 + $0x1b8] sm:$0xff] %v1402_v49  ;;  %v1344_v54 = vmul.f32 %v1764_v18, %v1312_v57  ;;  %v1282_v31 = vmul.f32 %v1768_v34, %v1218_v43 }
 0x2ff   :  { %1467 = vst [vmem:[#allocation2 + $0x1c0] sm:$0xff] %v1403_v59  ;;  %1468 = vst [vmem:[#allocation2 + $0x1c8] sm:$0xff] %v1404_v12  ;;  %v1345_v14 = vmul.f32 %v1766_v58, %v1313_v30 }
 0x300   :  { %v1405_v55 = vmul.f32 %v3418_v21, %v1344_v54  ;;  %v1406_v17 = vmul.f32 %v3419_v39, %v1344_v54  ;;  %v1314_v25 = vsub.f32 2.0, %v1282_v31 }
 0x301   :  { %v1407_v45 = vmul.f32 %v3420_v52, %v1345_v14  ;;  %v1408_v63 = vmul.f32 %v3421_v4, %v1345_v14 }
 0x302   :  { %1469 = vst [vmem:[#allocation2 + $0x1d0] sm:$0xff] %v1405_v55  ;;  %1470 = vst [vmem:[#allocation2 + $0x1d8] sm:$0xff] %v1406_v17  ;;  %v1346_v6 = vmul.f32 %v1768_v34, %v1314_v25 }
 0x303   :  { %1471 = vst [vmem:[#allocation2 + $0x1e0] sm:$0xff] %v1407_v45  ;;  %1472 = vst [vmem:[#allocation2 + $0x1e8] sm:$0xff] %v1408_v63 }
 0x304   :  { %v1409_v61 = vmul.f32 %v3422_v42, %v1346_v6  ;;  %v1410_v16 = vmul.f32 %v3423_v48, %v1346_v6 }
 0x306   :  { %1473 = vst [vmem:[#allocation2 + $0x1f0] sm:$0xff] %v1409_v61  ;;  %1474 = vst [vmem:[#allocation2 + $0x1f8] sm:$0xff] %v1410_v16 }
 0x307   :  { %1780 = shalt.err (!%p1777_p4)
}
 0x308   :  { %s1781_s11 = scalar_lea.hbm %s3201_s3, 8192 }
 0x309   :  { %p1782_p5 = scmp.ne.s32.totalorder %s3201_s3, %s1781_s11  ;;  %p1785_p6 = scmp.lt.u32.totalorder %s1781_s11, %s3201_s3 }
 0x30b   :  { %p1787_p7 = pnand %p1785_p6, %p1782_p5 }
 0x30d   :  { %1790 = shalt.err (!%p1787_p7)
}
 0x30e   :  { %s1796_s16 = smov 256   ;;  %s1797_s17 = smov 16  }
 0x30f   :  { %1486 = dma.vmem_to_hbm [thread:$0]  %s1481_s7, 8192, %s3201_s3, [#allocation3], %s1796_s16, %s1796_s16, %s1797_s17  }
 0x310   :  { %1791 = dma.done.wait [#allocation3], 8192  }
 0x311   :  { %1792 = vsyncadd [#allocation3], 4294959104 }
 0x312   :  { %1490 = vsyncpa [#allocation3], 1 }

</bundles_post_ra>
